<compile_context>
chip_gen: v7x
topology: tpu7x:2x2x1
jax: 0.10.0
libtpu: 0.0.40
codegen_flags: <defaults>
</compile_context>

<pallas_src>
import functools
import math

import jax
import jax.numpy as jnp
from jax import lax
from jax.experimental import pallas as pl
from jax.experimental.pallas import tpu as pltpu


def _conv_bn_kernel(x_ref, w_ref, bias_ref, o_ref, xpad_ref, *, KH, KW, pad, dil):
    """Fused Conv2d(KHxKW, stride=1, pad, dil, bias=False) + BatchNorm (folded).

    x_ref:    (1, H, W, Cin)           NHWC input tile (one batch), bf16
    w_ref:    (KH*KW*Cin, Ct)          BN-scale-folded im2col weights, bf16
    bias_ref: (1, Ct)                  folded BN bias (beta - mean*scale), f32
    o_ref:    (1, Hout, Wout, Ct)      bf16 output tile (padded channels zero)
    xpad_ref: (H+2p, W+2p, Cin)        bf16 VMEM scratch holding the halo slab
    """
    H, W, Cin = x_ref.shape[1], x_ref.shape[2], x_ref.shape[3]
    Hout, Wout = o_ref.shape[1], o_ref.shape[2]

    # ---- In-kernel halo: build the zero-padded slab as a value and do ONE
    # aligned full store (no separate zeroing pass, no f32 up-cast). ----------
    xp = x_ref[0]                                             # (H, W, Cin) bf16
    if pad > 0:
        zc = jnp.zeros((H, pad, Cin), dtype=xp.dtype)
        xp = jnp.concatenate([zc, xp, zc], axis=1)            # (H, W+2p, Cin)
        zr = jnp.zeros((pad, W + 2 * pad, Cin), dtype=xp.dtype)
        xp = jnp.concatenate([zr, xp, zr], axis=0)            # (H+2p, W+2p, Cin)
    xpad_ref[...] = xp

    # ---- im2col: fold all KH*KW taps into the contraction dimension so the
    # MXU sees a single dot with K = KH*KW*Cin (no per-tap accumulator RMW). --
    wins = []
    for kh in range(KH):
        for kw in range(KW):
            wins.append(xpad_ref[kh * dil:kh * dil + Hout,
                                 kw * dil:kw * dil + Wout, :])
    patch = jnp.concatenate(wins, axis=-1)                    # (Hout, Wout, KH*KW*Cin)
    patch = patch.reshape(Hout * Wout, KH * KW * Cin)         # bf16

    acc = jnp.dot(patch, w_ref[...], preferred_element_type=jnp.float32)
    y = acc + bias_ref[...]                                   # (+ (1, Ct) broadcast)
    o_ref[0] = y.reshape(Hout, Wout, -1).astype(o_ref.dtype)  # bf16 writeback


def _round_up(x, m):
    return (x + m - 1) // m * m


def _tile_bytes(shape, dtype):
    """Rough VMEM footprint of one tile (lane/sublane padded)."""
    itemsize = jnp.dtype(dtype).itemsize
    dims = list(shape)
    dims[-1] = _round_up(dims[-1], 128)
    if len(dims) >= 2:
        dims[-2] = _round_up(dims[-2], 8 * (4 // itemsize))
    return math.prod(dims) * itemsize


def basic_conv2d(x_nchw, weight_oihw, gamma, beta, mean, var, *,
                 stride=1, padding=0, dilation=1, eps=1e-5,
                 nchw_f32_output=True):
    """BasicConv2d forward. x_nchw: (N, Cin, H, W) f32.

    Returns NCHW f32 (module-parity path) when nchw_f32_output=True, else the
    raw kernel output (N, Hout, Wout, Cpad) bf16 (preferred for layer chaining).
    """
    if stride != 1:
        # TODO(synk): stride > 1 not implemented (SAM2UNet uses stride=1 only).
        raise NotImplementedError("stride > 1 not supported by the Pallas path")

    N, Cin, H, W = x_nchw.shape
    Cout, _, KH, KW = weight_oihw.shape
    Hout = H + 2 * padding - dilation * (KH - 1)
    Wout = W + 2 * padding - dilation * (KW - 1)

    Cpad = _round_up(Cout, 128)                    # lane-dense output channels
    # v6e/v7x MXUs are 256 wide; use a 256 Cout tile when possible (128 matches v5e).
    tile_c = 256 if Cpad % 256 == 0 else 128
    n_ct = Cpad // tile_c
    Kdim = KH * KW * Cin

    # Fold inference-mode BN into the conv weights + a per-channel bias.
    scale = gamma / jnp.sqrt(var + eps)            # (Cout,)
    bias = beta - mean * scale                     # (Cout,)

    # (Cout,Cin,KH,KW) -> (KH,KW,Cin,Cout) * scale -> pad Cout -> (KH*KW*Cin, Cpad)
    w = jnp.transpose(weight_oihw, (2, 3, 1, 0)) * scale[None, None, None, :]
    w = jnp.pad(w, ((0, 0), (0, 0), (0, 0), (0, Cpad - Cout)))
    w = w.reshape(Kdim, Cpad).astype(jnp.bfloat16)

    bias_p = jnp.pad(bias, (0, Cpad - Cout)).reshape(1, Cpad).astype(jnp.float32)

    x = jnp.transpose(x_nchw, (0, 2, 3, 1)).astype(jnp.bfloat16)   # NHWC, bf16

    kernel = functools.partial(_conv_bn_kernel, KH=KH, KW=KW,
                               pad=padding, dil=dilation)

    # Explicit VMEM budget: 2x buffered in/out blocks + weights/bias + scratch,
    # with slack; clamped to a ceiling that is safe on v7x (64 MiB physical).
    vmem_needed = (
        2 * _tile_bytes((1, H, W, Cin), jnp.bfloat16)
        + 2 * _tile_bytes((Kdim, tile_c), jnp.bfloat16)
        + 2 * _tile_bytes((1, tile_c), jnp.float32)
        + 2 * _tile_bytes((1, Hout, Wout, tile_c), jnp.bfloat16)
        + _tile_bytes((H + 2 * padding, W + 2 * padding, Cin), jnp.bfloat16)
    )
    vmem_limit = int(min(48 << 20, max(2 * vmem_needed + (4 << 20), 8 << 20)))

    out = pl.pallas_call(
        kernel,
        out_shape=jax.ShapeDtypeStruct((N, Hout, Wout, Cpad), jnp.bfloat16),
        grid_spec=pltpu.PrefetchScalarGridSpec(
            num_scalar_prefetch=0,
            grid=(N, n_ct),
            in_specs=[
                pl.BlockSpec((1, H, W, Cin), lambda n, c: (n, 0, 0, 0)),
                pl.BlockSpec((Kdim, tile_c), lambda n, c: (0, c)),
                pl.BlockSpec((1, tile_c), lambda n, c: (0, c)),
            ],
            out_specs=pl.BlockSpec((1, Hout, Wout, tile_c),
                                   lambda n, c: (n, 0, 0, c)),
            scratch_shapes=[
                pltpu.VMEM((H + 2 * padding, W + 2 * padding, Cin),
                           jnp.bfloat16),
            ],
        ),
        compiler_params=pltpu.CompilerParams(
            dimension_semantics=("parallel", "parallel"),
            vmem_limit_bytes=vmem_limit),
    )(x, w, bias_p)

    if nchw_f32_output:
        # Module-parity path only; for layer chaining keep NHWC bf16 output.
        out = jnp.transpose(out[..., :Cout], (0, 3, 1, 2)).astype(jnp.float32)
    return out


def reference_basic_conv2d(x_nchw, weight_oihw, gamma, beta, mean, var, *,
                           stride=1, padding=0, dilation=1, eps=1e-5):
    """Pure-JAX f32 reference (lax conv) for correctness check."""
    y = lax.conv_general_dilated(
        x_nchw, weight_oihw, window_strides=(stride, stride),
        padding=((padding, padding), (padding, padding)),
        rhs_dilation=(dilation, dilation),
        dimension_numbers=("NCHW", "OIHW", "NCHW"))
    scale = gamma / jnp.sqrt(var + eps)
    bias = beta - mean * scale
    return y * scale[None, :, None, None] + bias[None, :, None, None]


if __name__ == "__main__":
    key = jax.random.PRNGKey(0)
    kx, kw_, kg, kb, km, kv = jax.random.split(key, 6)

    N, Cin, H, W = 2, 4, 16, 16
    Cout, K = 8, 3
    padding, dilation = 1, 1          # typical SAM2UNet 3x3 "same" conv

    x = jax.random.normal(kx, (N, Cin, H, W), jnp.float32)
    weight = 0.1 * jax.random.normal(kw_, (Cout, Cin, K, K), jnp.float32)
    gamma = 1.0 + 0.1 * jax.random.normal(kg, (Cout,), jnp.float32)
    beta = 0.1 * jax.random.normal(kb, (Cout,), jnp.float32)
    mean = 0.1 * jax.random.normal(km, (Cout,), jnp.float32)
    var = 1.0 + 0.5 * jax.random.uniform(kv, (Cout,), jnp.float32)

    out = basic_conv2d(x, weight, gamma, beta, mean, var,
                       stride=1, padding=padding, dilation=dilation)
    out = jax.block_until_ready(out)

    ref = reference_basic_conv2d(x, weight, gamma, beta, mean, var,
                                 stride=1, padding=padding, dilation=dilation)

    assert out.shape == (N, Cout, H, W), out.shape
    max_err = float(jnp.max(jnp.abs(out - ref)))
    # bf16 matmul operands + bf16 output writeback with f32 accumulation ->
    # small rounding error vs the f32 reference.
    assert jnp.allclose(out, ref, atol=4e-2, rtol=4e-2), max_err

    print("KERNEL_OK")
</pallas_src>

<mosaic_0001>
module attributes {stable_mosaic.version = 11 : i64} {
  func.func @_conv_bn_kernel(%arg0: i32, %arg1: i32, %arg2: memref<1x16x16x4xbf16, #tpu.memory_space<vmem>>, %arg3: memref<36x128xbf16, #tpu.memory_space<vmem>>, %arg4: memref<1x128xf32, #tpu.memory_space<vmem>>, %arg5: memref<1x16x16x128xbf16, #tpu.memory_space<vmem>>, %arg6: memref<18x18x4xbf16, #tpu.memory_space<vmem>>) attributes {dimension_semantics = [#tpu.dimension_semantics<parallel>, #tpu.dimension_semantics<parallel>], iteration_bounds = array<i64: 2, 1>, scalar_prefetch = 0 : i64, scratch_operands = 1 : i64, tpu.core_type = #tpu.core_type<tc>, window_params = [{transform_indices = @transform_0, window_bounds = array<i64: 1, 16, 16, 4>}, {transform_indices = @transform_1, window_bounds = array<i64: 36, 128>}, {transform_indices = @transform_2, window_bounds = array<i64: 1, 128>}, {transform_indices = @transform_3, window_bounds = array<i64: 1, 16, 16, 128>}]} {
    %c0 = arith.constant 0 : index
    %c0_0 = arith.constant 0 : index
    %c0_1 = arith.constant 0 : index
    %c0_2 = arith.constant 0 : index
    %0 = vector.load %arg2[%c0, %c0_0, %c0_1, %c0_2] : memref<1x16x16x4xbf16, #tpu.memory_space<vmem>>, vector<1x16x16x4xbf16>
    %1 = vector.shape_cast %0 : vector<1x16x16x4xbf16> to vector<16x16x4xbf16>
    %cst = arith.constant 0.000000e+00 : bf16
    %2 = vector.broadcast %cst : bf16 to vector<16x1x4xbf16>
    %3 = tpu.concatenate %2, %1, %2 in 1 : vector<16x1x4xbf16>, vector<16x16x4xbf16>, vector<16x1x4xbf16> -> vector<16x18x4xbf16>
    %cst_3 = arith.constant 0.000000e+00 : bf16
    %4 = vector.broadcast %cst_3 : bf16 to vector<1x18x4xbf16>
    %5 = tpu.concatenate %4, %3, %4 in 0 : vector<1x18x4xbf16>, vector<16x18x4xbf16>, vector<1x18x4xbf16> -> vector<18x18x4xbf16>
    %c0_4 = arith.constant 0 : index
    %c0_5 = arith.constant 0 : index
    %c0_6 = arith.constant 0 : index
    %6 = vector.load %arg6[%c0_4, %c0_5, %c0_6] : memref<18x18x4xbf16, #tpu.memory_space<vmem>>, vector<18x18x4xbf16>
    tpu.vector_store %arg6[%c0_4, %c0_5, %c0_6], %5 {strides = array<i32>} : memref<18x18x4xbf16, #tpu.memory_space<vmem>>, vector<18x18x4xbf16>,
    %c0_7 = arith.constant 0 : index
    %c0_8 = arith.constant 0 : index
    %c0_9 = arith.constant 0 : index
    %7 = vector.load %arg6[%c0_7, %c0_8, %c0_9] : memref<18x18x4xbf16, #tpu.memory_space<vmem>>, vector<16x16x4xbf16>
    %c0_10 = arith.constant 0 : index
    %c1 = arith.constant 1 : index
    %c0_11 = arith.constant 0 : index
    %8 = vector.load %arg6[%c0_10, %c1, %c0_11] : memref<18x18x4xbf16, #tpu.memory_space<vmem>>, vector<16x16x4xbf16>
    %c0_12 = arith.constant 0 : index
    %c2 = arith.constant 2 : index
    %c0_13 = arith.constant 0 : index
    %9 = vector.load %arg6[%c0_12, %c2, %c0_13] : memref<18x18x4xbf16, #tpu.memory_space<vmem>>, vector<16x16x4xbf16>
    %c1_14 = arith.constant 1 : index
    %c0_15 = arith.constant 0 : index
    %c0_16 = arith.constant 0 : index
    %10 = vector.load %arg6[%c1_14, %c0_15, %c0_16] : memref<18x18x4xbf16, #tpu.memory_space<vmem>>, vector<16x16x4xbf16>
    %c1_17 = arith.constant 1 : index
    %c1_18 = arith.constant 1 : index
    %c0_19 = arith.constant 0 : index
    %11 = vector.load %arg6[%c1_17, %c1_18, %c0_19] : memref<18x18x4xbf16, #tpu.memory_space<vmem>>, vector<16x16x4xbf16>
    %c1_20 = arith.constant 1 : index
    %c2_21 = arith.constant 2 : index
    %c0_22 = arith.constant 0 : index
    %12 = vector.load %arg6[%c1_20, %c2_21, %c0_22] : memref<18x18x4xbf16, #tpu.memory_space<vmem>>, vector<16x16x4xbf16>
    %c2_23 = arith.constant 2 : index
    %c0_24 = arith.constant 0 : index
    %c0_25 = arith.constant 0 : index
    %13 = vector.load %arg6[%c2_23, %c0_24, %c0_25] : memref<18x18x4xbf16, #tpu.memory_space<vmem>>, vector<16x16x4xbf16>
    %c2_26 = arith.constant 2 : index
    %c1_27 = arith.constant 1 : index
    %c0_28 = arith.constant 0 : index
    %14 = vector.load %arg6[%c2_26, %c1_27, %c0_28] : memref<18x18x4xbf16, #tpu.memory_space<vmem>>, vector<16x16x4xbf16>
    %c2_29 = arith.constant 2 : index
    %c2_30 = arith.constant 2 : index
    %c0_31 = arith.constant 0 : index
    %15 = vector.load %arg6[%c2_29, %c2_30, %c0_31] : memref<18x18x4xbf16, #tpu.memory_space<vmem>>, vector<16x16x4xbf16>
    %16 = tpu.concatenate %7, %8, %9, %10, %11, %12, %13, %14, %15 in 2 : vector<16x16x4xbf16>, vector<16x16x4xbf16>, vector<16x16x4xbf16>, vector<16x16x4xbf16>, vector<16x16x4xbf16>, vector<16x16x4xbf16>, vector<16x16x4xbf16>, vector<16x16x4xbf16>, vector<16x16x4xbf16> -> vector<16x16x36xbf16>
    %17 = vector.shape_cast %16 : vector<16x16x36xbf16> to vector<256x36xbf16>
    %c0_32 = arith.constant 0 : index
    %c0_33 = arith.constant 0 : index
    %18 = vector.load %arg3[%c0_32, %c0_33] : memref<36x128xbf16, #tpu.memory_space<vmem>>, vector<36x128xbf16>
    %cst_34 = arith.constant dense<0.000000e+00> : vector<256x128xf32>
    %19 = tpu.matmul %17, %18, %cst_34 {dimension_numbers = #tpu.dot_dimension_numbers<[1], [0], [0], [1], [0, 0, 1, 1], [], []>} : vector<256x36xbf16>, vector<36x128xbf16>, vector<256x128xf32> -> vector<256x128xf32>
    %c0_35 = arith.constant 0 : index
    %c0_36 = arith.constant 0 : index
    %20 = vector.load %arg4[%c0_35, %c0_36] : memref<1x128xf32, #tpu.memory_space<vmem>>, vector<1x128xf32>
    %21 = vector.broadcast %20 : vector<1x128xf32> to vector<256x128xf32>
    %22 = arith.addf %19, %21 : vector<256x128xf32>
    %23 = vector.shape_cast %22 : vector<256x128xf32> to vector<16x16x128xf32>
    %24 = arith.truncf %23 : vector<16x16x128xf32> to vector<16x16x128xbf16>
    %c0_37 = arith.constant 0 : index
    %c0_38 = arith.constant 0 : index
    %c0_39 = arith.constant 0 : index
    %c0_40 = arith.constant 0 : index
    %25 = vector.load %arg5[%c0_37, %c0_38, %c0_39, %c0_40] : memref<1x16x16x128xbf16, #tpu.memory_space<vmem>>, vector<1x16x16x128xbf16>
    %26 = vector.shape_cast %25 : vector<1x16x16x128xbf16> to vector<16x16x128xbf16>
    %27 = vector.shape_cast %24 : vector<16x16x128xbf16> to vector<1x16x16x128xbf16>
    tpu.vector_store %arg5[%c0_37, %c0_38, %c0_39, %c0_40], %27 {strides = array<i32>} : memref<1x16x16x128xbf16, #tpu.memory_space<vmem>>, vector<1x16x16x128xbf16>,
    return
  }
  func.func @transform_0(%arg0: i32, %arg1: i32) -> (i32, i32, i32, i32) {
    %c0_i32 = arith.constant 0 : i32
    %c0_i32_0 = arith.constant 0 : i32
    %c0_i32_1 = arith.constant 0 : i32
    %c0_i32_2 = arith.constant 0 : i32
    return %arg0, %c0_i32, %c0_i32_0, %c0_i32_1 : i32, i32, i32, i32
  }
  func.func @transform_1(%arg0: i32, %arg1: i32) -> (i32, i32) {
    %c0_i32 = arith.constant 0 : i32
    %c0_i32_0 = arith.constant 0 : i32
    return %c0_i32, %arg1 : i32, i32
  }
  func.func @transform_2(%arg0: i32, %arg1: i32) -> (i32, i32) {
    %c0_i32 = arith.constant 0 : i32
    %c0_i32_0 = arith.constant 0 : i32
    return %c0_i32, %arg1 : i32, i32
  }
  func.func @transform_3(%arg0: i32, %arg1: i32) -> (i32, i32, i32, i32) {
    %c0_i32 = arith.constant 0 : i32
    %c0_i32_0 = arith.constant 0 : i32
    %c0_i32_1 = arith.constant 0 : i32
    return %arg0, %c0_i32, %c0_i32_0, %arg1 : i32, i32, i32, i32
  }
}

</mosaic_0001>

<bundles_post_ra>
// kernel: tpu_custom_call.1
= control target key start
LH: loop header
LB: loop body
LE: loop exit
PB: predicated region body
PF: predicated region fallthrough
CT: control target
= control target key end

     0   :  { %8 = vsyncpa [#allocation4], 0  ;;  %s5359_s0 = inlined_call_operand.vmem [shape: bf16[2,16,16,4], index: 0, kind: input, shape index: {}]   ;;  %s5360_s1 = inlined_call_operand.vmem [shape: bf16[36,128], index: 1, kind: input, shape index: {}]   ;;  %s5361_s2 = inlined_call_operand.vmem [shape: f32[1,128], index: 2, kind: input, shape index: {}]   ;;  %s5362_s3 = inlined_call_operand.hbm [shape: bf16[2,16,16,128], index: 3, kind: output, shape index: {}]  }
   0x1   :  { %10 = vsyncpa [#allocation4 + $0x1], 0  ;;  %s4009_s12 = smov 0   ;;  %s4011_s13 = smov 0  }
   0x2   :  { %s4013_s14 = smov 0   ;;  %s4015_s15 = smov 0  }
   0x3   :  { %s4017_s16 = smov 0   ;;  %s4019_s17 = smov 0  }
   0x4 LB: > { %s3208_s18 = sadd.s32 4294967295, %s3976_s17   ;;  %s3209_s19 = sadd.s32 4294967294, %s3976_s17   ;;  %s3976_s17 = sphi %s4019_s17, %s16_s17   ;;  %s3972_s16 = sphi %s4017_s16, %s5376_s16   ;;  %s3968_s15 = sphi %s4015_s15, %s5375_s15   ;;  %s3964_s14 = sphi %s4013_s14, %s5374_s14   ;;  %s3960_s13 = sphi %s4011_s13, %s5373_s13   ;;  %s3956_s12 = sphi %s4009_s12, %s5372_s12  }
   0x5   : > { %s28_s20 = sadd.s32 1, %s3972_s16  ;;  %s115_s21 = sadd.s32 1, %s3964_s14 }
   0x6   : > { %p30_p0 = scmp.ge.s32.totalorder %s28_s20, 2  ;;  %p125_p1 = scmp.ne.s32.totalorder %s3964_s14, %s3960_s13 }
   0x7   : > { %p126_p2 = scmp.eq.s32.totalorder %s3208_s18, 1  ;;  %p131_p3 = scmp.ne.s32.totalorder %s3960_s13, %s3956_s12 }
   0x8   : > { %s5378_s20 = smov (%p30_p0, %s28_s20), 0  ;;  %p132_p5 = scmp.eq.s32.totalorder %s3209_s19, 1 }
   0x9   : > { %p4049_p4 = por %p126_p2, %p125_p1  ;;  %s110_s23 = ssub.s32 %s3972_s16, %s5378_s20 }
   0xa   : > { %p3214_p6 = scmp.ge.s32.totalorder %s3976_s17, 1  ;;  %p113_p7 = scmp.eq.s32.totalorder %s110_s23, 0 }
   0xb   : > { %p4056_p8 = por %p132_p5, %p131_p3  ;;  %p171_p9 = scmp.lt.s32.totalorder %s3976_s17, 3 }
   0xc   : > { %s4062_s25 = scalar_select %p113_p7, %s3964_s14, %s115_s21  }
   0xd   : > { %p172_p10 = pnand %p3214_p6, %p171_p9 }
   0xf   : > { %175 = sbr.rel (%p172_p10) target bundleno = 654 (0x28e), region = 32 }
  0x16   : > { %vm689_vm0 = vcmask 27648   ;;  %vm692_vm1 = vcmask 24576   ;;  %v3978_v0 = vmov 0   ;;  %p202_p11 = scmp.lt.s32.totalorder %s3968_s15, 1  ;;  %vm1340_vm2 = vcmask 1046528   ;;  %s3979_s4 = smov 8  }
  0x17   : > { %v3234_v1 = vcombine.low %v3978_v0, %v3978_v0  ;;  %v3235_v2 = vcombine.high %v3978_v0, %v3978_v0  ;;  %vm472_vm3 = vsmask.f32 256  ;;  %vm471_vm4 = vcmask 1040384   ;;  %s3980_s5 = smov 4   ;;  %s3981_s6 = smov 12  }
  0x18   : > { %s203_s26 = scalar_select %p202_p11, %s3968_s15, 1  ;;  %vm1067_vm5 = vsmask.f32 7424  ;;  %vm4079_vm6 = vmand %vm471_vm4, %vm472_vm3  ;;  %vm2769_vm7 = vcmask 1041408   ;;  %vm2445_vm8 = vcmask 31744   ;;  %vm2478_vm9 = vcmask 64512  }
  0x19   : > { %690 = vst.msk [vmem:[#allocation2] sm:$0xf] %vm689_vm0, %v3234_v1  ;;  %691 = vst.msk [vmem:[#allocation2 + $0x4] sm:$0xf] %vm689_vm0, %v3235_v2  ;;  %s3982_s7 = smov 20   ;;  %s3983_s8 = smov 16  }
  0x1a   : > { %693 = vst.msk [vmem:[#allocation2 + $0x8] sm:$0x1] %vm692_vm1, %v3234_v1  ;;  %744 = vst.msk [vmem:[#allocation2 + $0xd4] sm:$0x1] %vm692_vm1, %v3234_v1  ;;  %s3485_s27 = sshll.u32 %s203_s26, 7  ;;  %s3984_s11 = smov 24  }
  0x1b   : > { %742 = vst.msk [vmem:[#allocation2 + $0xcc] sm:$0xf] %vm689_vm0, %v3234_v1  ;;  %743 = vst.msk [vmem:[#allocation2 + $0xd0] sm:$0xf] %vm689_vm0, %v3235_v2  ;;  %s4075_s30 = scalar_lea.vmem %s5359_s0, %s3485_s27  ;;  %s3985_s21 = smov 28   ;;  %vm2511_vm10 = vcmask 97280  }
  0x1c   : > { %v3747_v3 = vld [vmem:[%s4075_s30 + $0x40] sm:$0xff]   ;;  %v3753_v17 = vld [vmem:[%s4075_s30 + $0x48] sm:$0xff]   ;;  %v3759_v23 = vld [vmem:[%s4075_s30 + $0x38] sm:$0xff]   ;;  %s3986_s23 = smov 32   ;;  %vm2544_vm11 = vcmask 130048   ;;  %vm2577_vm12 = vcmask 162816  }
  0x1d   : > { %v3750_v4 = vld [vmem:[%s4075_s30] sm:$0xff]   ;;  %v384_v5 = vshrl.u32 %v3747_v3, 16  ;;  %v387_v6 = vshll.u32 %v3747_v3, 16  ;;  %v3756_v18 = vld [vmem:[%s4075_s30 + $0x8] sm:$0xff]   ;;  %v391_v27 = vshrl.u32 %v3753_v17, 16  ;;  %v394_v31 = vshll.u32 %v3753_v17, 16 }
  0x1e   : > { %v328_v15 = vshrl.u32 %v3750_v4, 16  ;;  %v331_v16 = vshll.u32 %v3750_v4, 16  ;;  %v335_v37 = vshrl.u32 %v3756_v18, 16  ;;  %v338_v38 = vshll.u32 %v3756_v18, 16  ;;  %s199_s28 = sand.u32 1, %s3960_s13   ;;  %s3987_s19 = smov [#allocation3]  }
  0x1f   : > { %v386_v12 = vrot.slane %v384_v5, 7  ;;  %v393_v36 = vrot.slane %v391_v27, 7  ;;  %v377_v39 = vshrl.u32 %v3759_v23, 16  ;;  %v380_v42 = vshll.u32 %v3759_v23, 16 }
  0x20   : > { %v746_v7 = vld [vmem:[#allocation2 + $0x4] sm:$0xf]  ;;  %v793_v8 = vld [vmem:[#allocation2] sm:$0xe]  ;;  %v330_v26 = vrot.slane %v328_v15, 7  ;;  %v337_v47 = vrot.slane %v335_v37, 7 }
  0x21   : > { %v3744_v9 = vld [vmem:[#allocation2 + $0x8] ss:$0 sps:$4 sm:$0x11]   ;;  %v3316_v10 = vcombine.low %v793_v8, %v746_v7  ;;  %v745_v11 = vld [vmem:[#allocation2] sm:$0xf]  ;;  %v389_v22 = vor.u32 %v387_v6, %v386_v12  ;;  %v396_v46 = vor.u32 %v394_v31, %v393_v36  ;;  %v379_v49 = vrot.slane %v377_v39, 7 }
  0x22   : > { %v4083_v14 = vcombine.low %v745_v11, %v746_v7  ;;  %v1342_v20 = vrot.slane %v3744_v9, 1  ;;  %v1076_v21 = vshll.u32 %v3744_v9, 16  ;;  %v333_v35 = vor.u32 %v331_v16, %v330_v26 }
  0x23   : > { %v1341_v19 = vrot.slane %v3316_v10, 1  ;;  %v482_v30 = vsel %vm4079_vm6, 0, %v389_v22  ;;  %v490_v43 = vsel %vm4079_vm6, %v330_v26, 0  ;;  %v498_v51 = vsel %vm4079_vm6, %v386_v12, 0 }
  0x24   : > { %v1069_v24 = vshrl.u32 %v4083_v14, 16  ;;  %v1071_v25 = vshll.u32 %v4083_v14, 16  ;;  %v1078_v29 = vrot.slane %v1076_v21, 1  ;;  %v3260_v33 = vcombine.low %v482_v30, %v482_v30 }
  0x25   : > { %v1343_v28 = vsel %vm1340_vm2, %v1341_v19, %v1342_v20  ;;  %v3261_v34 = vcombine.high %v482_v30, %v482_v30  ;;  %v474_v41 = vsel %vm4079_vm6, 0, %v333_v35  ;;  %v3238_v50 = vcombine.low %v490_v43, %v490_v43 }
  0x26   : > { %1389 = vrot.lane.b32.xlu0 %v1343_v28, %s3979_s4  ;;  %v1073_v32 = vrot.slane %v1071_v25, 1  ;;  %718 = vst.msk [vmem:[#allocation2 + $0x6c] sm:$0xf] %vm689_vm0, %v3260_v33  ;;  %v3236_v44 = vcombine.low %v474_v41, %v474_v41  ;;  %v3237_v45 = vcombine.high %v474_v41, %v474_v41  ;;  %v483_v52 = vsel %vm4079_vm6, 0, %v396_v46 }
  0x27   : > { %719 = vst.msk [vmem:[#allocation2 + $0x70] sm:$0xf] %vm689_vm0, %v3261_v34  ;;  %v340_v53 = vor.u32 %v338_v38, %v337_v47  ;;  %v3262_v54 = vcombine.low %v498_v51, %v498_v51  ;;  %v491_v55 = vsel %vm4079_vm6, %v337_v47, 0  ;;  %v3263_v56 = vcombine.low %v483_v52, %v483_v52 }
  0x28   : > { %v1074_v40 = vor.u32 %v1073_v32, %v1069_v24  ;;  %694 = vst.msk [vmem:[#allocation2 + $0xc] sm:$0xf] %vm689_vm0, %v3236_v44  ;;  %695 = vst.msk [vmem:[#allocation2 + $0x10] sm:$0xf] %vm689_vm0, %v3237_v45  ;;  %v3264_v57 = vcombine.high %v483_v52, %v483_v52  ;;  %v382_v58 = vor.u32 %v380_v42, %v379_v49  ;;  %v497_v59 = vsel %vm4079_vm6, %v379_v49, 0 }
  0x29   : > { %696 = vst.msk [vmem:[#allocation2 + $0x14] sm:$0x1] %vm692_vm1, %v3238_v50  ;;  %v475_v60 = vsel %vm4079_vm6, 0, %v340_v53  ;;  %v3259_v61 = vcombine.low %v497_v59, %v497_v59  ;;  %720 = vst.msk [vmem:[#allocation2 + $0x74] sm:$0x1] %vm692_vm1, %v3262_v54  ;;  %v3241_v62 = vcombine.low %v491_v55, %v491_v55  ;;  %v499_v63 = vsel %vm4079_vm6, %v393_v36, 0 }
  0x2a   : > { %v1079_v48 = vsel %vm1067_vm5, %v1074_v40, %v1078_v29  ;;  %721 = vst.msk [vmem:[#allocation2 + $0x78] sm:$0xf] %vm689_vm0, %v3263_v56  ;;  %722 = vst.msk [vmem:[#allocation2 + $0x7c] sm:$0xf] %vm689_vm0, %v3264_v57  ;;  %v3239_v0 = vcombine.low %v475_v60, %v475_v60  ;;  %v3240_v1 = vcombine.high %v475_v60, %v475_v60  ;;  %v481_v2 = vsel %vm4079_vm6, 0, %v382_v58 }
  0x2b   : > { %1260 = vrot.lane.b32.xlu0 %v1079_v48, %s3980_s5  ;;  %v3265_v3 = vcombine.low %v499_v63, %v499_v63  ;;  %v3257_v6 = vcombine.low %v481_v2, %v481_v2  ;;  %v3258_v7 = vcombine.high %v481_v2, %v481_v2  ;;  %717 = vst.msk [vmem:[#allocation2 + $0x68] sm:$0x1] %vm692_vm1, %v3259_v61  ;;  %699 = vst.msk [vmem:[#allocation2 + $0x20] sm:$0x1] %vm692_vm1, %v3241_v62  ;;  %vm2610_vm13 = vcmask 195584  }
  0x2c   : > { %697 = vst.msk [vmem:[#allocation2 + $0x18] sm:$0xf] %vm689_vm0, %v3239_v0  ;;  %698 = vst.msk [vmem:[#allocation2 + $0x1c] sm:$0xf] %vm689_vm0, %v3240_v1  ;;  %vm2643_vm14 = vcmask 228352   ;;  %vm2676_vm15 = vcmask 261120  }
  0x2d   : > { %v826_v4 = vld [vmem:[#allocation2 + $0x6c] sm:$0xf]  ;;  %723 = vst.msk [vmem:[#allocation2 + $0x80] sm:$0x1] %vm692_vm1, %v3265_v3  ;;  %vm2736_vm3 = vcmask 293888  }
  0x2e   : > { %v827_v5 = vld [vmem:[#allocation2 + $0x70] sm:$0xf]  ;;  %v866_v8 = vld [vmem:[#allocation2 + $0x6c] sm:$0xe]  ;;  %715 = vst.msk [vmem:[#allocation2 + $0x60] sm:$0xf] %vm689_vm0, %v3257_v6 }
  0x2f   : > { %v4124_v9 = vcombine.low %v826_v4, %v827_v5  ;;  %v764_v10 = vld [vmem:[#allocation2 + $0x70] sm:$0xf]  ;;  %v802_v11 = vld [vmem:[#allocation2 + $0x6c] sm:$0xe]  ;;  %716 = vst.msk [vmem:[#allocation2 + $0x64] sm:$0xf] %vm689_vm0, %v3258_v7  ;;  %v3372_v16 = vcombine.low %v866_v8, %v827_v5 }
  0x30   : > { %v810_v12 = vld [vmem:[#allocation2 + $0xc] sm:$0xf]  ;;  %v811_v15 = vld [vmem:[#allocation2 + $0x10] sm:$0xf]  ;;  %v3325_v20 = vcombine.low %v802_v11, %v764_v10 }
  0x31   : > { %1517 = vrot.lane.b32.xlu1 %v4124_v9, %s3981_s6  ;;  %v858_v17 = vld [vmem:[#allocation2 + $0xc] sm:$0xe]  ;;  %v3332_v18 = vcombine.low %v810_v12, %v811_v15  ;;  %v748_v19 = vld [vmem:[#allocation2 + $0x10] sm:$0xf]  ;;  %v828_v24 = vld [vmem:[#allocation2 + $0x78] sm:$0xf] }
  0x32   : > { %v794_v21 = vld [vmem:[#allocation2 + $0xc] sm:$0xe]  ;;  %v3763_v22 = vld [vmem:[#allocation2 + $0x14] ss:$0 sps:$4 sm:$0x11]   ;;  %v3364_v23 = vcombine.low %v858_v17, %v811_v15  ;;  %v1680_v27 = vshll.u32 %v4124_v9, 16 }
  0x33   : > { %1501 = vrot.lane.b32.xlu0 %v3332_v18, %s3981_s6  ;;  %v4134_v25 = vld [vmem:[#allocation2 + $0x7c] sm:$0xf]  ;;  %v3317_v26 = vcombine.low %v794_v21, %v748_v19  ;;  %v1584_v28 = vshll.u32 %v3332_v18, 16  ;;  %v1345_v30 = vrot.slane %v3763_v22, 1  ;;  %v812_v31 = vld [vmem:[#allocation2 + $0x18] sm:$0xf] }
  0x34   : > { %v4138_v29 = vcombine.low %v828_v24, %v4134_v25  ;;  %v4140_v32 = vld [vmem:[#allocation2 + $0x1c] sm:$0xf]  ;;  %v1368_v33 = vrot.slane %v3325_v20, 1  ;;  %v1877_v34 = vrot.slane %v3372_v16, 1  ;;  %v763_v39 = vld [vmem:[#allocation2 + $0x6c] sm:$0xf] }
  0x35   : > { %v4145_v35 = vcombine.low %v812_v31, %v4140_v32  ;;  %v801_v37 = vld [vmem:[#allocation2 + $0x60] sm:$0xe]  ;;  %v1344_v38 = vrot.slane %v3317_v26, 1  ;;  %v1582_v40 = vshrl.u32 %v3332_v18, 16  ;;  %v1853_v44 = vrot.slane %v3364_v23, 1  ;;  %v3775_v11 = vld [vmem:[%s4075_s30 + $0x10] sm:$0xff]  }
  0x36   : > { %1519 = vrot.lane.b32.xlu1 %v4138_v29, %s3981_s6  ;;  %v762_v36 = vld [vmem:[#allocation2 + $0x64] sm:$0xf]  ;;  %v3760_v41 = vld [vmem:[#allocation2 + $0x68] ss:$0 sps:$4 sm:$0x11]   ;;  %v1586_v49 = vrot.slane %v1584_v28, 1  ;;  %v4156_v58 = vcombine.low %v763_v39, %v764_v10 }
  0x37   : > { %v3324_v42 = vcombine.low %v801_v37, %v762_v36  ;;  %v761_v43 = vld [vmem:[#allocation2 + $0x60] sm:$0xf]  ;;  %v1596_v45 = vshll.u32 %v4145_v35, 16  ;;  %1503 = vrot.lane.b32.xlu0 %v4145_v35, %s3981_s6  ;;  %v1346_v47 = vsel %vm1340_vm2, %v1344_v38, %v1345_v30  ;;  %v747_v48 = vld [vmem:[#allocation2 + $0xc] sm:$0xf]  ;;  %v1366_v51 = vrot.slane %v3760_v41, 1 }
  0x38   : > { %v4150_v46 = vcombine.low %v761_v43, %v762_v36  ;;  %v4153_v52 = vcombine.low %v747_v48, %v748_v19  ;;  %v3767_v53 = vld [vmem:[#allocation2 + $0x74] ss:$0 sps:$4 sm:$0x11]   ;;  %v1088_v54 = vshll.u32 %v3763_v22, 16  ;;  %v1172_v56 = vshll.u32 %v3760_v41, 16 }
  0x39   : > { %v1365_v50 = vrot.slane %v3324_v42, 1  ;;  %v3769_v55 = vld [vmem:[#allocation2 + $0x14] ss:$0 sps:$4 sm:$0x11]   ;;  %v1369_v59 = vrot.slane %v3767_v53, 1  ;;  %v1587_v10 = vor.u32 %v1586_v49, %v1582_v40  ;;  %v1594_v20 = vshrl.u32 %v4145_v35, 16 }
  0x3a   : > { %v3770_v60 = vld [vmem:[#allocation2 + $0x74] ss:$0 sps:$4 sm:$0x11]   ;;  %v1854_v61 = vrot.slane %v3769_v55, 1  ;;  %v1165_v62 = vshrl.u32 %v4150_v46, 16  ;;  %v1167_v63 = vshll.u32 %v4150_v46, 16 }
  0x3b   : > { %v1367_v57 = vsel %vm1340_vm2, %v1365_v50, %v1366_v51  ;;  %1391 = vrot.lane.b32.xlu0 %v1346_v47, %s3979_s4  ;;  %v1589_v0 = vshll.u32 %v3769_v55, 16  ;;  %v1370_v1 = vsel %vm1340_vm2, %v1368_v33, %v1369_v59  ;;  %v1878_v2 = vrot.slane %v3770_v60, 1  ;;  %v3771_v5 = vld [vmem:[#allocation2 + $0x20] ss:$0 sps:$4 sm:$0x11]  }
  0x3c   : > { %1405 = vrot.lane.b32.xlu1 %v1367_v57, %s3979_s4  ;;  %v1081_v3 = vshrl.u32 %v4153_v52, 16  ;;  %v1083_v4 = vshll.u32 %v4153_v52, 16  ;;  %v1855_v6 = vsel %vm1340_vm2, %v1853_v44, %v1854_v61  ;;  %v1169_v7 = vrot.slane %v1167_v63, 1  ;;  %v859_v12 = vld [vmem:[#allocation2 + $0x18] sm:$0xe] }
  0x3d   : > { %v1174_v8 = vrot.slane %v1172_v56, 1  ;;  %v1879_v15 = vsel %vm1340_vm2, %v1877_v34, %v1878_v2  ;;  %v1591_v16 = vrot.slane %v1589_v0, 1  ;;  %v1090_v18 = vrot.slane %v1088_v54, 1  ;;  %v875_v38 = vld [vmem:[#allocation2 + $0x18] sm:$0xf] }
  0x3e   : > { %v1085_v17 = vrot.slane %v1083_v4, 1  ;;  %v1170_v19 = vor.u32 %v1169_v7, %v1165_v62  ;;  %v1598_v21 = vrot.slane %v1596_v45, 1  ;;  %v1601_v22 = vshll.u32 %v3771_v5, 16  ;;  %v4181_v42 = vld [vmem:[#allocation2 + $0x1c] sm:$0xf]  ;;  %v3782_v62 = vld [vmem:[%s4075_s30 + $0x50] sm:$0xff]  }
  0x3f   : > { %1901 = vrot.lane.b32.xlu0 %v1855_v6, %s3982_s7  ;;  %v1177_v24 = vshrl.u32 %v4156_v58, 16  ;;  %v1179_v26 = vshll.u32 %v4156_v58, 16  ;;  %v1184_v28 = vshll.u32 %v3767_v53, 16  ;;  %v3365_v30 = vcombine.low %v859_v12, %v4140_v32  ;;  %v4185_v48 = vld [vmem:[#allocation2 + $0x80] ss:$0 sps:$4 sm:$0x11]  }
  0x40   : > { %1407 = vrot.lane.b32.xlu1 %v1370_v1, %s3979_s4  ;;  %v1086_v23 = vor.u32 %v1085_v17, %v1081_v3  ;;  %v1175_v31 = vsel %vm1067_vm5, %v1170_v19, %v1174_v8  ;;  %v342_v33 = vshrl.u32 %v3775_v11, 16  ;;  %v1692_v34 = vshll.u32 %v4138_v29, 16  ;;  %v867_v50 = vld [vmem:[#allocation2 + $0x78] sm:$0xe]  ;;  %v4206_v7 = vld [vmem:[#allocation2 + $0x7c] sm:$0xf] }
  0x41   : > { %v1181_v36 = vrot.slane %v1179_v26, 1  ;;  %v1678_v37 = vshrl.u32 %v4124_v9, 16  ;;  %v345_v35 = vshll.u32 %v3775_v11, 16  ;;  %v1599_v39 = vor.u32 %v1598_v21, %v1594_v20  ;;  %v4200_v3 = vld [vmem:[#allocation2 + $0x20] ss:$0 sps:$4 sm:$0x11]  }
  0x42   : > { %v1603_v40 = vrot.slane %v1601_v22, 1  ;;  %v1682_v41 = vrot.slane %v1680_v27, 1  ;;  %v1685_v32 = vshll.u32 %v3770_v60, 16  ;;  %v1592_v43 = vsel %vm1067_vm5, %v1587_v10, %v1591_v16  ;;  %v749_v17 = vld [vmem:[#allocation2 + $0x18] sm:$0xf] }
  0x43   : > { %1276 = vrot.lane.b32.xlu0 %v1175_v31, %s3980_s5  ;;  %v1091_v44 = vsel %vm1067_vm5, %v1086_v23, %v1090_v18  ;;  %v1182_v45 = vor.u32 %v1181_v36, %v1177_v24  ;;  %v1186_v47 = vrot.slane %v1184_v28, 1  ;;  %v1856_v49 = vrot.slane %v3365_v30, 1  ;;  %v4211_v20 = vld [vmem:[#allocation2 + $0x1c] sm:$0xf]  ;;  %v923_v23 = vld [vmem:[#allocation2 + $0x18] sm:$0xe] }
  0x44   : > { %1917 = vrot.lane.b32.xlu1 %v1879_v15, %s3982_s7  ;;  %v1857_v51 = vrot.slane %v3771_v5, 1  ;;  %v1683_v53 = vor.u32 %v1682_v41, %v1678_v37  ;;  %v1687_v54 = vrot.slane %v1685_v32, 1  ;;  %v344_v55 = vrot.slane %v342_v33, 7  ;;  %v3849_v33 = vld [vmem:[%s5360_s1] sm:$0xff]  }
  0x45   : > { %v1604_v9 = vsel %vm1067_vm5, %v1599_v39, %v1603_v40  ;;  %v3380_v27 = vcombine.low %v875_v38, %v4181_v42  ;;  %v1690_v56 = vshrl.u32 %v4138_v29, 16  ;;  %v1187_v57 = vsel %vm1067_vm5, %v1182_v45, %v1186_v47  ;;  %v931_v39 = vld [vmem:[#allocation2 + $0x78] sm:$0xe]  ;;  %v4233_v32 = vld [vmem:[#allocation2 + $0x80] ss:$0 sps:$4 sm:$0x11]   ;;  %3633 = vmatprep.subr.bf16.mxu0 %v3849_v33  ;;  %3671 = vmatprep.subr.bf16.mxu1 %v3849_v33 }
  0x46   : > { %v1694_v59 = vrot.slane %v1692_v34, 1  ;;  %v1697_v60 = vshll.u32 %v4185_v48, 16  ;;  %v347_v61 = vor.u32 %v345_v35, %v344_v55  ;;  %v3373_v63 = vcombine.low %v867_v50, %v4134_v25  ;;  %v891_v25 = vld [vmem:[#allocation2 + $0x78] sm:$0xf]  ;;  %3634 = vmatpush3.bf16.msra.mxu0 %v3849_v33  ;;  %3674 = vmatpush3.bf16.msra.mxu1 %v3849_v33 }
  0x47   : > { %1773 = vrot.lane.b32.xlu0 %v1592_v43, %s3983_s8  ;;  %v1858_v0 = vsel %vm1340_vm2, %v1856_v49, %v1857_v51  ;;  %v1688_v1 = vsel %vm1067_vm5, %v1683_v53, %v1687_v54  ;;  %v492_v29 = vsel %vm4079_vm6, %v344_v55, 0  ;;  %v2096_v4 = vshll.u32 %v3380_v27, 16  ;;  %v4240_v49 = vld [vmem:[#allocation2 + $0x20] ss:$0 sps:$4 sm:$0x11]   ;;  %v3799_v33 = vld [vmem:[%s4075_s30 + $0x18] sm:$0xff]  }
  0x48   : > { %1262 = vrot.lane.b32.xlu1 %v1091_v44, %s3980_s5  ;;  %v476_v2 = vsel %vm4079_vm6, 0, %v347_v61  ;;  %v3244_v8 = vcombine.low %v492_v29, %v492_v29  ;;  %v1695_v10 = vor.u32 %v1694_v59, %v1690_v56  ;;  %v1699_v11 = vrot.slane %v1697_v60, 1  ;;  %v765_v54 = vld [vmem:[#allocation2 + $0x78] sm:$0xf] }
  0x49   : > { %v3242_v5 = vcombine.low %v476_v2, %v476_v2  ;;  %v3243_v6 = vcombine.high %v476_v2, %v476_v2  ;;  %v398_v12 = vshrl.u32 %v3782_v62, 16  ;;  %v401_v15 = vshll.u32 %v3782_v62, 16 }
  0x4a   : > { %v1880_v16 = vrot.slane %v3373_v63, 1  ;;  %702 = vst.msk [vmem:[#allocation2 + $0x2c] sm:$0x1] %vm692_vm1, %v3244_v8  ;;  %v2094_v18 = vshrl.u32 %v3380_v27, 16  ;;  %v2098_v21 = vrot.slane %v2096_v4, 1  ;;  %v2101_v22 = vshll.u32 %v4200_v3, 16 }
  0x4b   : > { %1775 = vrot.lane.b32.xlu0 %v1604_v9, %s3983_s8  ;;  %700 = vst.msk [vmem:[#allocation2 + $0x24] sm:$0xf] %vm689_vm0, %v3242_v5  ;;  %701 = vst.msk [vmem:[#allocation2 + $0x28] sm:$0xf] %vm689_vm0, %v3243_v6  ;;  %v400_v19 = vrot.slane %v398_v12, 7  ;;  %v1700_v24 = vsel %vm1067_vm5, %v1695_v10, %v1699_v11  ;;  %v1881_v26 = vrot.slane %v4185_v48, 1  ;;  %v4219_v28 = vcombine.low %v891_v25, %v4206_v7 }
  0x4c   : > { %1278 = vrot.lane.b32.xlu1 %v1187_v57, %s3980_s5  ;;  %v4229_v36 = vcombine.low %v749_v17, %v4211_v20  ;;  %v2099_v38 = vor.u32 %v2098_v21, %v2094_v18  ;;  %v2103_v35 = vrot.slane %v2101_v22, 1  ;;  %v3412_v43 = vcombine.low %v923_v23, %v4181_v42  ;;  %v4254_v57 = vld [vmem:[#allocation2 + $0x7c] sm:$0xf]  ;;  %v3852_v63 = vld [vmem:[%s5360_s1 + $0x8] sm:$0xff]  }
  0x4d   : > { %v403_v30 = vor.u32 %v401_v15, %v400_v19  ;;  %v500_v31 = vsel %vm4079_vm6, %v400_v19, 0  ;;  %v1882_v47 = vsel %vm1340_vm2, %v1880_v16, %v1881_v26  ;;  %v2192_v48 = vshll.u32 %v4219_v28, 16  ;;  %v4263_v4 = vld [vmem:[#allocation2 + $0x80] ss:$0 sps:$4 sm:$0x11]   ;;  %3635 = vmatprep.subr.bf16.mxu0 %v3852_v63  ;;  %3672 = vmatprep.subr.bf16.mxu1 %v3852_v63 }
  0x4e   : > { %v3268_v37 = vcombine.low %v500_v31, %v500_v31  ;;  %v3420_v42 = vcombine.low %v931_v39, %v4206_v7  ;;  %v1095_v53 = vshll.u32 %v4229_v36, 16  ;;  %v2104_v9 = vsel %vm1067_vm5, %v2099_v38, %v2103_v35  ;;  %3636 = vmatpush3.bf16.msra.mxu0 %v3852_v63  ;;  %3675 = vmatpush3.bf16.msra.mxu1 %v3852_v63  ;;  %v795_v39 = vld [vmem:[#allocation2 + $0x18] sm:$0xe] }
  0x4f   : > { %1903 = vrot.lane.b32.xlu0 %v1858_v0, %s3982_s7  ;;  %v484_v34 = vsel %vm4079_vm6, 0, %v403_v30  ;;  %v2365_v59 = vrot.slane %v3412_v43, 1  ;;  %v2190_v60 = vshrl.u32 %v4219_v28, 16  ;;  %v2194_v61 = vrot.slane %v2192_v48, 1 }
  0x50   : > { %1789 = vrot.lane.b32.xlu1 %v1688_v1, %s3983_s8  ;;  %v3266_v40 = vcombine.low %v484_v34, %v484_v34  ;;  %v3267_v41 = vcombine.high %v484_v34, %v484_v34  ;;  %726 = vst.msk [vmem:[#allocation2 + $0x8c] sm:$0x1] %vm692_vm1, %v3268_v37  ;;  %v2197_v62 = vshll.u32 %v4233_v32, 16  ;;  %v1093_v6 = vshrl.u32 %v4229_v36, 16 }
  0x51   : > { %v4244_v51 = vld [vmem:[#allocation2 + $0x2c] ss:$0 sps:$4 sm:$0x11]   ;;  %v1097_v25 = vrot.slane %v1095_v53, 1  ;;  %v1100_v7 = vshll.u32 %v4240_v49, 16  ;;  %v4268_v8 = vcombine.low %v765_v54, %v4254_v57  ;;  %v2366_v11 = vrot.slane %v4200_v3, 1 }
  0x52   : > { %v877_v44 = vld [vmem:[#allocation2 + $0x24] sm:$0xf]  ;;  %v4236_v45 = vld [vmem:[#allocation2 + $0x28] sm:$0xf]  ;;  %724 = vst.msk [vmem:[#allocation2 + $0x84] sm:$0xf] %vm689_vm0, %v3266_v40  ;;  %v2195_v17 = vor.u32 %v2194_v61, %v2190_v60 }
  0x53   : > { %2013 = vrot.lane.b32.xlu0 %v3380_v27, %s3984_s11  ;;  %v3381_v50 = vcombine.low %v877_v44, %v4236_v45  ;;  %725 = vst.msk [vmem:[#allocation2 + $0x88] sm:$0xf] %vm689_vm0, %v3267_v41  ;;  %v2113_v56 = vshll.u32 %v4244_v51, 16  ;;  %v751_v2 = vld [vmem:[#allocation2 + $0x24] sm:$0xf]  ;;  %v2199_v18 = vrot.slane %v2197_v62, 1  ;;  %v2367_v40 = vsel %vm1340_vm2, %v2365_v59, %v2366_v11 }
  0x54   : > { %1791 = vrot.lane.b32.xlu1 %v1700_v24, %s3983_s8  ;;  %v4261_v29 = vld [vmem:[#allocation2 + $0x28] sm:$0xf]  ;;  %v924_v5 = vld [vmem:[#allocation2 + $0x24] sm:$0xe]  ;;  %v2389_v19 = vrot.slane %v3420_v42, 1  ;;  %v2390_v24 = vrot.slane %v4233_v32, 1 }
  0x55   : > { %v2108_v55 = vshll.u32 %v3381_v50, 16  ;;  %v2106_v27 = vshrl.u32 %v3381_v50, 16  ;;  %v2115_v1 = vrot.slane %v2113_v56, 1  ;;  %v4279_v21 = vcombine.low %v751_v2, %v4261_v29  ;;  %v4294_v32 = vld [vmem:[#allocation2 + $0x2c] ss:$0 sps:$4 sm:$0x11]  }
  0x56   : > { %v3413_v26 = vcombine.low %v924_v5, %v4236_v45  ;;  %v1102_v30 = vrot.slane %v1100_v7, 1  ;;  %v1191_v31 = vshll.u32 %v4268_v8, 16  ;;  %v1189_v38 = vshrl.u32 %v4268_v8, 16  ;;  %v796_v63 = vld [vmem:[#allocation2 + $0x24] sm:$0xe] }
  0x57   : > { %2015 = vrot.lane.b32.xlu0 %v3381_v50, %s3984_s11  ;;  %v2110_v0 = vrot.slane %v2108_v55, 1  ;;  %v4274_v12 = vld [vmem:[#allocation2 + $0x8c] ss:$0 sps:$4 sm:$0x11]   ;;  %v1196_v35 = vshll.u32 %v4263_v4, 16  ;;  %v2200_v41 = vsel %vm1067_vm5, %v2195_v17, %v2199_v18  ;;  %v1107_v43 = vshll.u32 %v4279_v21, 16 }
  0x58   : > { %1919 = vrot.lane.b32.xlu1 %v1882_v47, %s3982_s7  ;;  %v2209_v3 = vshll.u32 %v4274_v12, 16  ;;  %v2368_v53 = vrot.slane %v3413_v26, 1  ;;  %v1193_v54 = vrot.slane %v1191_v31, 1  ;;  %v3318_v55 = vcombine.low %v795_v39, %v4211_v20  ;;  %v4314_v11 = vld [vmem:[#allocation2 + $0x8c] ss:$0 sps:$4 sm:$0x11]  }
  0x59   : > { %v2111_v10 = vor.u32 %v2110_v0, %v2106_v27  ;;  %v893_v15 = vld [vmem:[#allocation2 + $0x84] sm:$0xf]  ;;  %v2369_v27 = vrot.slane %v4244_v51, 1  ;;  %v349_v56 = vshrl.u32 %v3799_v33, 16  ;;  %v352_v59 = vshll.u32 %v3799_v33, 16 }
  0x5a   : > { %v4276_v16 = vld [vmem:[#allocation2 + $0x88] sm:$0xf]  ;;  %v767_v44 = vld [vmem:[#allocation2 + $0x84] sm:$0xf]  ;;  %v2211_v47 = vrot.slane %v2209_v3, 1  ;;  %v1105_v60 = vshrl.u32 %v4279_v21, 16  ;;  %v2391_v2 = vsel %vm1340_vm2, %v2389_v19, %v2390_v24  ;;  %v1194_v51 = vor.u32 %v1193_v54, %v1189_v38 }
  0x5b   : > { %2285 = vrot.lane.b32.xlu0 %v2104_v9, %s3985_s21  ;;  %v2116_v22 = vsel %vm1067_vm5, %v2111_v10, %v2115_v1  ;;  %v3389_v23 = vcombine.low %v893_v15, %v4276_v16  ;;  %v4297_v48 = vld [vmem:[#allocation2 + $0x88] sm:$0xf]  ;;  %v932_v50 = vld [vmem:[#allocation2 + $0x84] sm:$0xe]  ;;  %v1109_v61 = vrot.slane %v1107_v43, 1  ;;  %v1112_v62 = vshll.u32 %v4294_v32, 16 }
  0x5c   : > { %2029 = vrot.lane.b32.xlu1 %v4219_v28, %s3984_s11  ;;  %v1098_v28 = vor.u32 %v1097_v25, %v1093_v6  ;;  %v4307_v0 = vcombine.low %v767_v44, %v4297_v48  ;;  %v3421_v20 = vcombine.low %v932_v50, %v4276_v16  ;;  %v351_v5 = vrot.slane %v349_v56, 7  ;;  %v3806_v6 = vld [vmem:[%s4075_s30 + $0x58] sm:$0xff]   ;;  %v814_v33 = vld [vmem:[#allocation2 + $0x24] sm:$0xf] }
  0x5d   : > { %v2204_v34 = vshll.u32 %v3389_v23, 16  ;;  %v2202_v37 = vshrl.u32 %v3389_v23, 16  ;;  %v1198_v25 = vrot.slane %v1196_v35, 1  ;;  %v1347_v7 = vrot.slane %v3318_v55, 1  ;;  %v4324_v3 = vld [vmem:[#allocation2 + $0x78] sm:$0xe] }
  0x5e   : > { %v1103_v42 = vsel %vm1067_vm5, %v1098_v28, %v1102_v30  ;;  %v1348_v10 = vrot.slane %v4240_v49, 1  ;;  %v2370_v15 = vsel %vm1340_vm2, %v2368_v53, %v2369_v27  ;;  %v3319_v16 = vcombine.low %v796_v63, %v4261_v29  ;;  %v3813_v29 = vld [vmem:[%s4075_s30 + $0x20] sm:$0xff]  }
  0x5f   : > { %2287 = vrot.lane.b32.xlu0 %v2116_v22, %s3985_s21  ;;  %v2206_v45 = vrot.slane %v2204_v34, 1  ;;  %v354_v17 = vor.u32 %v352_v59, %v351_v5  ;;  %v493_v18 = vsel %vm4079_vm6, %v351_v5, 0  ;;  %v1110_v19 = vor.u32 %v1109_v61, %v1105_v60  ;;  %v4330_v34 = vld [vmem:[#allocation2 + $0x28] sm:$0xf]  ;;  %v3820_v43 = vld [vmem:[%s4075_s30 + $0x60] sm:$0xff]  }
  0x60   : > { %2031 = vrot.lane.b32.xlu1 %v3389_v23, %s3984_s11  ;;  %v1114_v22 = vrot.slane %v1112_v62, 1  ;;  %v2393_v23 = vrot.slane %v4274_v12, 1  ;;  %v1203_v49 = vshll.u32 %v4307_v0, 16  ;;  %v2392_v24 = vrot.slane %v3421_v20, 1  ;;  %v804_v56 = vld [vmem:[#allocation2 + $0x84] sm:$0xe] }
  0x61   : > { %v2207_v9 = vor.u32 %v2206_v45, %v2202_v37  ;;  %v477_v26 = vsel %vm4079_vm6, 0, %v354_v17  ;;  %v3247_v28 = vcombine.low %v493_v18, %v493_v18  ;;  %v405_v30 = vshrl.u32 %v3806_v6, 16  ;;  %v830_v5 = vld [vmem:[#allocation2 + $0x84] sm:$0xf] }
  0x62   : > { %v1208_v31 = vshll.u32 %v4314_v11, 16  ;;  %v3245_v37 = vcombine.low %v477_v26, %v477_v26  ;;  %v3246_v38 = vcombine.high %v477_v26, %v477_v26  ;;  %v408_v12 = vshll.u32 %v3806_v6, 16 }
  0x63   : > { %2413 = vrot.lane.b32.xlu0 %v2367_v40, %s3986_s23  ;;  %v2212_v1 = vsel %vm1067_vm5, %v2207_v9, %v2211_v47  ;;  %v1199_v35 = vsel %vm1067_vm5, %v1194_v51, %v1198_v25  ;;  %v1349_v39 = vsel %vm1340_vm2, %v1347_v7, %v1348_v10  ;;  %v3326_v40 = vcombine.low %v4324_v3, %v4254_v57 }
  0x64   : > { %2301 = vrot.lane.b32.xlu1 %v2200_v41, %s3985_s21  ;;  %705 = vst.msk [vmem:[#allocation2 + $0x38] sm:$0x1] %vm692_vm1, %v3247_v28  ;;  %v407_v41 = vrot.slane %v405_v30, 7  ;;  %v1115_v44 = vsel %vm1067_vm5, %v1110_v19, %v1114_v22  ;;  %v1351_v45 = vrot.slane %v4294_v32, 1  ;;  %v1201_v47 = vshrl.u32 %v4307_v0, 16 }
  0x65   : > { %v1205_v50 = vrot.slane %v1203_v49, 1  ;;  %703 = vst.msk [vmem:[#allocation2 + $0x30] sm:$0xf] %vm689_vm0, %v3245_v37  ;;  %704 = vst.msk [vmem:[#allocation2 + $0x34] sm:$0xf] %vm689_vm0, %v3246_v38  ;;  %v356_v54 = vshrl.u32 %v3813_v29, 16  ;;  %v2394_v55 = vsel %vm1340_vm2, %v2392_v24, %v2393_v23  ;;  %v3327_v10 = vcombine.low %v804_v56, %v4297_v48 }
  0x66   : > { %v410_v53 = vor.u32 %v408_v12, %v407_v41  ;;  %v501_v57 = vsel %vm4079_vm6, %v407_v41, 0  ;;  %v1350_v9 = vrot.slane %v3319_v16, 1  ;;  %v1210_v27 = vrot.slane %v1208_v31, 1  ;;  %v4371_v22 = vld [vmem:[#allocation2 + $0x88] sm:$0xf] }
  0x67   : > { %1264 = vrot.lane.b32.xlu0 %v1103_v42, %s3980_s5  ;;  %v4346_v42 = vcombine.low %v814_v33, %v4330_v34  ;;  %v3271_v32 = vcombine.low %v501_v57, %v501_v57  ;;  %v358_v60 = vrot.slane %v356_v54, 7  ;;  %v359_v61 = vshll.u32 %v3813_v29, 16  ;;  %v4400_v54 = vld [vmem:[#allocation2 + $0x8c] ss:$0 sps:$4 sm:$0x11]  }
  0x68   : > { %2303 = vrot.lane.b32.xlu1 %v2212_v1, %s3985_s21  ;;  %v485_v59 = vsel %vm4079_vm6, 0, %v410_v53  ;;  %v412_v62 = vshrl.u32 %v3820_v43, 16  ;;  %v1206_v63 = vor.u32 %v1205_v50, %v1201_v47  ;;  %v1352_v17 = vsel %vm1340_vm2, %v1350_v9, %v1351_v45  ;;  %v860_v47 = vld [vmem:[#allocation2 + $0x24] sm:$0xe] }
  0x69   : > { %v3269_v20 = vcombine.low %v485_v59, %v485_v59  ;;  %v3270_v1 = vcombine.high %v485_v59, %v485_v59  ;;  %729 = vst.msk [vmem:[#allocation2 + $0x98] sm:$0x1] %vm692_vm1, %v3271_v32  ;;  %v361_v6 = vor.u32 %v359_v61, %v358_v60  ;;  %v494_v51 = vsel %vm4079_vm6, %v358_v60, 0 }
  0x6a   : > { %v4358_v25 = vrot.slane %v412_v62, 7  ;;  %v1608_v7 = vshll.u32 %v4346_v42, 16  ;;  %v3250_v16 = vcombine.low %v494_v51, %v494_v51  ;;  %v1211_v23 = vsel %vm1067_vm5, %v1206_v63, %v1210_v27 }
  0x6b   : > { %2415 = vrot.lane.b32.xlu0 %v2370_v15, %s3986_s23  ;;  %v4362_v15 = vld [vmem:[#allocation2 + $0x2c] ss:$0 sps:$4 sm:$0x11]   ;;  %727 = vst.msk [vmem:[#allocation2 + $0x90] sm:$0xf] %vm689_vm0, %v3269_v20  ;;  %v1371_v49 = vrot.slane %v3326_v40, 1  ;;  %v3342_v33 = vcombine.low %v830_v5, %v4371_v22  ;;  %v3366_v56 = vcombine.low %v860_v47, %v4330_v34 }
  0x6c   : > { %2429 = vrot.lane.b32.xlu1 %v2391_v2, %s3986_s23  ;;  %v415_v2 = vshll.u32 %v3820_v43, 16  ;;  %728 = vst.msk [vmem:[#allocation2 + $0x94] sm:$0xf] %vm689_vm0, %v3270_v1  ;;  %v816_v18 = vld [vmem:[#allocation2 + $0x30] sm:$0xf]  ;;  %v1372_v3 = vrot.slane %v4263_v4, 1 }
  0x6d   : > { %v4369_v19 = vld [vmem:[#allocation2 + $0x34] sm:$0xf]  ;;  %708 = vst.msk [vmem:[#allocation2 + $0x44] sm:$0x1] %vm692_vm1, %v3250_v16  ;;  %v478_v26 = vsel %vm4079_vm6, 0, %v361_v6  ;;  %v1374_v30 = vrot.slane %v3327_v10, 1 }
  0x6e   : > { %v417_v48 = vor.u32 %v415_v2, %v4358_v25  ;;  %v3335_v24 = vcombine.low %v816_v18, %v4369_v19  ;;  %v1375_v29 = vrot.slane %v4314_v11, 1  ;;  %v1606_v31 = vshrl.u32 %v4346_v42, 16  ;;  %v4389_v40 = vld [vmem:[#allocation2 + $0x38] ss:$0 sps:$4 sm:$0x11]  }
  0x6f   : > { %1266 = vrot.lane.b32.xlu0 %v1115_v44, %s3980_s5  ;;  %v1610_v4 = vrot.slane %v1608_v7, 1  ;;  %v1613_v37 = vshll.u32 %v4362_v15, 16  ;;  %v3248_v38 = vcombine.low %v478_v26, %v478_v26  ;;  %v3249_v12 = vcombine.high %v478_v26, %v478_v26  ;;  %v861_v60 = vld [vmem:[#allocation2 + $0x30] sm:$0xe]  ;;  %v4412_v6 = vld [vmem:[#allocation2 + $0x34] sm:$0xf] }
  0x70   : > { %1280 = vrot.lane.b32.xlu1 %v1199_v35, %s3980_s5  ;;  %v486_v28 = vsel %vm4079_vm6, 0, %v417_v48  ;;  %v1373_v35 = vsel %vm1340_vm2, %v1371_v49, %v1372_v3  ;;  %v1704_v45 = vshll.u32 %v3342_v33, 16  ;;  %v1376_v50 = vsel %vm1340_vm2, %v1374_v30, %v1375_v29  ;;  %v4409_v62 = vld [vmem:[#allocation2 + $0x98] ss:$0 sps:$4 sm:$0x11]  }
  0x71   : > { %v3272_v41 = vcombine.low %v486_v28, %v486_v28  ;;  %706 = vst.msk [vmem:[#allocation2 + $0x3c] sm:$0xf] %vm689_vm0, %v3248_v38  ;;  %707 = vst.msk [vmem:[#allocation2 + $0x40] sm:$0xf] %vm689_vm0, %v3249_v12  ;;  %v3273_v44 = vcombine.high %v486_v28, %v486_v28  ;;  %v1611_v53 = vor.u32 %v1610_v4, %v1606_v31  ;;  %v1615_v57 = vrot.slane %v1613_v37, 1 }
  0x72   : > { %v832_v11 = vld [vmem:[#allocation2 + $0x90] sm:$0xf]  ;;  %v1625_v27 = vshll.u32 %v4389_v40, 16  ;;  %v1702_v59 = vshrl.u32 %v3342_v33, 16  ;;  %v1709_v61 = vshll.u32 %v4400_v54, 16  ;;  %v1859_v34 = vrot.slane %v3366_v56, 1 }
  0x73   : > { %1393 = vrot.lane.b32.xlu0 %v1349_v39, %s3979_s4  ;;  %v1620_v39 = vshll.u32 %v3335_v24, 16  ;;  %v4391_v43 = vld [vmem:[#allocation2 + $0x94] sm:$0xf]  ;;  %730 = vst.msk [vmem:[#allocation2 + $0x9c] sm:$0xf] %vm689_vm0, %v3272_v41  ;;  %v1616_v63 = vsel %vm1067_vm5, %v1611_v53, %v1615_v57  ;;  %v1860_v51 = vrot.slane %v4362_v15, 1  ;;  %v3367_v10 = vcombine.low %v861_v60, %v4369_v19 }
  0x74   : > { %2431 = vrot.lane.b32.xlu1 %v2394_v55, %s3986_s23  ;;  %731 = vst.msk [vmem:[#allocation2 + $0xa0] sm:$0xf] %vm689_vm0, %v3273_v44  ;;  %v1618_v55 = vshrl.u32 %v3335_v24, 16  ;;  %v3343_v32 = vcombine.low %v832_v11, %v4391_v43  ;;  %v1627_v1 = vrot.slane %v1625_v27, 1  ;;  %v879_v5 = vld [vmem:[#allocation2 + $0x30] sm:$0xf] }
  0x75   : > { %v1622_v9 = vrot.slane %v1620_v39, 1  ;;  %v868_v16 = vld [vmem:[#allocation2 + $0x84] sm:$0xe]  ;;  %v1721_v18 = vshll.u32 %v4409_v62, 16  ;;  %v3382_v48 = vcombine.low %v879_v5, %v4412_v6  ;;  %v502_v15 = vsel %vm4079_vm6, %v4358_v25, 0 }
  0x76   : > { %v1716_v2 = vshll.u32 %v3343_v32, 16  ;;  %v1714_v49 = vshrl.u32 %v3343_v32, 16  ;;  %v4424_v19 = vld [vmem:[#allocation2 + $0x94] sm:$0xf]  ;;  %v3274_v26 = vcombine.low %v502_v15, %v502_v15  ;;  %v3374_v28 = vcombine.low %v868_v16, %v4371_v22  ;;  %v925_v53 = vld [vmem:[#allocation2 + $0x30] sm:$0xe] }
  0x77   : > { %1395 = vrot.lane.b32.xlu0 %v1352_v17, %s3979_s4  ;;  %v1623_v20 = vor.u32 %v1622_v9, %v1618_v55  ;;  %v1711_v17 = vrot.slane %v1709_v61, 1  ;;  %v1861_v30 = vsel %vm1340_vm2, %v1859_v34, %v1860_v51  ;;  %v1862_v31 = vrot.slane %v3367_v10, 1  ;;  %v4443_v44 = vld [vmem:[#allocation2 + $0x38] ss:$0 sps:$4 sm:$0x11]  }
  0x78   : > { %1282 = vrot.lane.b32.xlu1 %v1211_v23, %s3980_s5  ;;  %v1718_v3 = vrot.slane %v1716_v2, 1  ;;  %732 = vst.msk [vmem:[#allocation2 + $0xa4] sm:$0x1] %vm692_vm1, %v3274_v26  ;;  %v1723_v4 = vrot.slane %v1721_v18, 1  ;;  %v2120_v37 = vshll.u32 %v3382_v48, 16  ;;  %v1883_v39 = vrot.slane %v3374_v28, 1 }
  0x79   : > { %v1628_v23 = vsel %vm1067_vm5, %v1623_v20, %v1627_v1  ;;  %v881_v38 = vld [vmem:[#allocation2 + $0x3c] sm:$0xf]  ;;  %v4433_v12 = vld [vmem:[#allocation2 + $0x40] sm:$0xf]  ;;  %v3414_v60 = vcombine.low %v925_v53, %v4412_v6  ;;  %v1887_v20 = vrot.slane %v4409_v62, 1  ;;  %v3837_v1 = vld [vmem:[%s4075_s30 + $0x28] sm:$0xff]  }
  0x7a   : > { %v1719_v25 = vor.u32 %v1718_v3, %v1714_v49  ;;  %v3383_v11 = vcombine.low %v881_v38, %v4433_v12  ;;  %v2122_v57 = vrot.slane %v2120_v37, 1  ;;  %v4448_v9 = vld [vmem:[#allocation2 + $0x44] ss:$0 sps:$4 sm:$0x11]   ;;  %v2372_v15 = vrot.slane %v4443_v44, 1 }
  0x7b   : > { %1505 = vrot.lane.b32.xlu0 %v4346_v42, %s3981_s6  ;;  %v1706_v42 = vrot.slane %v1704_v45, 1  ;;  %v2118_v45 = vshrl.u32 %v3382_v48, 16  ;;  %v4450_v27 = vld [vmem:[#allocation2 + $0x98] ss:$0 sps:$4 sm:$0x11]   ;;  %v2137_v10 = vshll.u32 %v4448_v9, 16 }
  0x7c   : > { %1409 = vrot.lane.b32.xlu1 %v1373_v35, %s3979_s4  ;;  %v869_v35 = vld [vmem:[#allocation2 + $0x90] sm:$0xe]  ;;  %v4452_v56 = vld [vmem:[#allocation2 + $0xa0] sm:$0xf]  ;;  %v2221_v51 = vshll.u32 %v4450_v27, 16  ;;  %v2371_v3 = vrot.slane %v3414_v60, 1 }
  0x7d   : > { %v1707_v7 = vor.u32 %v1706_v42, %v1702_v59  ;;  %v3375_v47 = vcombine.low %v869_v35, %v4391_v43  ;;  %v2132_v43 = vshll.u32 %v3383_v11, 16  ;;  %v2125_v59 = vshll.u32 %v4443_v44, 16  ;;  %v4457_v42 = vld [vmem:[#allocation2 + $0x34] sm:$0xf]  ;;  %v755_v35 = vld [vmem:[#allocation2 + $0x3c] sm:$0xf] }
  0x7e   : > { %v2123_v62 = vor.u32 %v2122_v57, %v2118_v45 }
  0x7f   : > { %1507 = vrot.lane.b32.xlu0 %v3335_v24, %s3981_s6  ;;  %v895_v24 = vld [vmem:[#allocation2 + $0x90] sm:$0xf]  ;;  %v1712_v29 = vsel %vm1067_vm5, %v1707_v7, %v1711_v17  ;;  %v2127_v6 = vrot.slane %v2125_v59, 1  ;;  %v2130_v17 = vshrl.u32 %v3383_v11, 16  ;;  %v2134_v18 = vrot.slane %v2132_v43, 1 }
  0x80   : > { %1411 = vrot.lane.b32.xlu1 %v1376_v50, %s3979_s4  ;;  %v4436_v22 = vcombine.low %v895_v24, %v4424_v19  ;;  %v1724_v50 = vsel %vm1067_vm5, %v1719_v25, %v1723_v4  ;;  %v933_v7 = vld [vmem:[#allocation2 + $0x90] sm:$0xe]  ;;  %v363_v24 = vshrl.u32 %v3837_v1, 16  ;;  %v4490_v45 = vld [vmem:[#allocation2 + $0xa4] ss:$0 sps:$4 sm:$0x11]  }
  0x81   : > { %v3422_v37 = vcombine.low %v933_v7, %v4424_v19  ;;  %v2135_v38 = vor.u32 %v2134_v18, %v2130_v17  ;;  %v2375_v17 = vrot.slane %v4448_v9, 1 }
  0x82   : > { %v2216_v55 = vshll.u32 %v4436_v22, 16  ;;  %v2214_v5 = vshrl.u32 %v4436_v22, 16  ;;  %v365_v25 = vrot.slane %v363_v24, 7 }
  0x83   : > { %1777 = vrot.lane.b32.xlu0 %v1616_v63, %s3983_s8  ;;  %v1886_v63 = vrot.slane %v3375_v47, 1 }
  0x84   : > { %1521 = vrot.lane.b32.xlu1 %v3342_v33, %s3981_s6  ;;  %v1863_v33 = vrot.slane %v4389_v40, 1  ;;  %v1884_v40 = vrot.slane %v4400_v54, 1  ;;  %v897_v54 = vld [vmem:[#allocation2 + $0x9c] sm:$0xf]  ;;  %v2218_v34 = vrot.slane %v2216_v55, 1  ;;  %v495_v60 = vsel %vm4079_vm6, %v365_v25, 0 }
  0x85   : > { %v4464_v2 = vcombine.low %v897_v54, %v4452_v56  ;;  %v1888_v49 = vsel %vm1340_vm2, %v1886_v63, %v1887_v20  ;;  %v769_v55 = vld [vmem:[#allocation2 + $0x90] sm:$0xf]  ;;  %v4512_v20 = vld [vmem:[#allocation2 + $0x44] ss:$0 sps:$4 sm:$0x11]  }
  0x86   : > { %v1864_v41 = vsel %vm1340_vm2, %v1862_v31, %v1863_v33  ;;  %v1885_v61 = vsel %vm1340_vm2, %v1883_v39, %v1884_v40  ;;  %v2219_v28 = vor.u32 %v2218_v34, %v2214_v5  ;;  %v2139_v31 = vrot.slane %v2137_v10, 1  ;;  %v4484_v39 = vld [vmem:[#allocation2 + $0x40] sm:$0xf]  ;;  %v3853_v34 = vld [vmem:[%s4075_s30 + $0x30] sm:$0xff]  }
  0x87   : > { %1779 = vrot.lane.b32.xlu0 %v1628_v23, %s3983_s8  ;;  %v926_v23 = vld [vmem:[#allocation2 + $0x3c] sm:$0xe]  ;;  %v2228_v26 = vshll.u32 %v4464_v2, 16  ;;  %v4500_v43 = vcombine.low %v755_v35, %v4484_v39  ;;  %v3253_v10 = vcombine.low %v495_v60, %v495_v60 }
  0x88   : > { %1523 = vrot.lane.b32.xlu1 %v3343_v32, %s3981_s6  ;;  %v753_v32 = vld [vmem:[#allocation2 + $0x30] sm:$0xf]  ;;  %v3415_v4 = vcombine.low %v926_v23, %v4433_v12  ;;  %v2226_v12 = vshrl.u32 %v4464_v2, 16 }
  0x89   : > { %v4470_v16 = vcombine.low %v753_v32, %v4457_v42  ;;  %v2230_v57 = vrot.slane %v2228_v26, 1  ;;  %v4497_v32 = vld [vmem:[#allocation2 + $0x94] sm:$0xf]  ;;  %711 = vst.msk [vmem:[#allocation2 + $0x50] sm:$0x1] %vm692_vm1, %v3253_v10  ;;  %v1129_v26 = vshrl.u32 %v4500_v43, 16 }
  0x8a   : > { %v4510_v63 = vrot.slane %v3415_v4, 1  ;;  %v4517_v7 = vcombine.low %v769_v55, %v4497_v32  ;;  %v797_v55 = vld [vmem:[#allocation2 + $0x30] sm:$0xe] }
  0x8b   : > { %1905 = vrot.lane.b32.xlu0 %v1861_v30, %s3982_s7  ;;  %v2223_v30 = vrot.slane %v2221_v51, 1  ;;  %v1119_v33 = vshll.u32 %v4470_v16, 16  ;;  %v1117_v44 = vshrl.u32 %v4470_v16, 16  ;;  %v2233_v51 = vshll.u32 %v4490_v45, 16 }
  0x8c   : > { %1793 = vrot.lane.b32.xlu1 %v1712_v29, %s3983_s8  ;;  %v4477_v29 = vld [vmem:[#allocation2 + $0x38] ss:$0 sps:$4 sm:$0x11]   ;;  %v2231_v9 = vor.u32 %v2230_v57, %v2226_v12  ;;  %v934_v57 = vld [vmem:[#allocation2 + $0x9c] sm:$0xe]  ;;  %v3320_v10 = vcombine.low %v797_v55, %v4457_v42 }
  0x8d   : > { %v2224_v19 = vsel %vm1067_vm5, %v2219_v28, %v2223_v30  ;;  %v1124_v53 = vshll.u32 %v4477_v29, 16  ;;  %v1121_v54 = vrot.slane %v1119_v33, 1  ;;  %v1136_v28 = vshll.u32 %v4512_v20, 16  ;;  %v4574_v42 = vld [vmem:[#allocation2 + $0xa4] ss:$0 sps:$4 sm:$0x11]  }
  0x8e   : > { %v370_v30 = vshrl.u32 %v3853_v34, 16  ;;  %v1215_v33 = vshll.u32 %v4517_v7, 16 }
  0x8f   : > { %1907 = vrot.lane.b32.xlu0 %v1864_v41, %s3982_s7  ;;  %v2128_v41 = vsel %vm1067_vm5, %v2123_v62, %v2127_v6  ;;  %v1126_v6 = vrot.slane %v1124_v53, 1 }
  0x90   : > { %1795 = vrot.lane.b32.xlu1 %v1724_v50, %s3983_s8  ;;  %v2373_v50 = vsel %vm1340_vm2, %v2371_v3, %v2372_v15  ;;  %v2396_v3 = vrot.slane %v4450_v27, 1  ;;  %v1131_v15 = vshll.u32 %v4500_v43, 16  ;;  %v3856_v27 = vld [vmem:[%s5360_s1 + $0x10] ss:$0 sps:$4 sm:$0x33]  }
  0x91   : > { %3677 = vmatprep.subr.msk.bf16.mxu0 %vm2769_vm7, %v3856_v27  ;;  %3678 = vmatprep.subr.msk.bf16.mxu1 %vm2769_vm7, %v3856_v27 }
  0x93   : > { %2017 = vrot.lane.b32.xlu0 %v3382_v48, %s3984_s11  ;;  %v366_v48 = vshll.u32 %v3837_v1, 16 }
  0x94   : > { %1921 = vrot.lane.b32.xlu1 %v1885_v61, %s3982_s7  ;;  %v2140_v61 = vsel %vm1067_vm5, %v2135_v38, %v2139_v31  ;;  %v4535_v31 = vld [vmem:[#allocation2 + $0x98] ss:$0 sps:$4 sm:$0x11]   ;;  %v4542_v38 = vld [vmem:[#allocation2 + $0xa0] sm:$0xf] }
  0x95   : > { %v368_v47 = vor.u32 %v366_v48, %v365_v25  ;;  %v2235_v48 = vrot.slane %v2233_v51, 1 }
  0x97   : > { %2019 = vrot.lane.b32.xlu0 %v3383_v11, %s3984_s11  ;;  %v3844_v11 = vld [vmem:[%s4075_s30 + $0x68] sm:$0xff]   ;;  %v479_v59 = vsel %vm4079_vm6, 0, %v368_v47  ;;  %v1133_v47 = vrot.slane %v1131_v15, 1  ;;  %v2376_v15 = vsel %vm1340_vm2, %v4510_v63, %v2375_v17  ;;  %v1353_v17 = vrot.slane %v3320_v10, 1  ;;  %v806_v10 = vld [vmem:[#allocation2 + $0x9c] sm:$0xe] }
  0x98   : > { %1923 = vrot.lane.b32.xlu1 %v1888_v49, %s3982_s7  ;;  %v4487_v40 = vpop.permute.xlu0 %1389  ;;  %v3251_v1 = vcombine.low %v479_v59, %v479_v59  ;;  %v3252_v5 = vcombine.high %v479_v59, %v479_v59  ;;  %v419_v62 = vshrl.u32 %v3844_v11, 16  ;;  %v422_v18 = vshll.u32 %v3844_v11, 16 }
  0x99   : > { %v1122_v49 = vor.u32 %v1121_v54, %v1117_v44  ;;  %v373_v44 = vshll.u32 %v3853_v34, 16  ;;  %v1213_v11 = vshrl.u32 %v4517_v7, 16  ;;  %v1220_v34 = vshll.u32 %v4535_v31, 16 }
  0x9a   : > { %709 = vst.msk [vmem:[#allocation2 + $0x48] sm:$0xf] %vm689_vm0, %v3251_v1  ;;  %710 = vst.msk [vmem:[#allocation2 + $0x4c] sm:$0xf] %vm689_vm0, %v3252_v5  ;;  %v421_v24 = vrot.slane %v419_v62, 7  ;;  %v2236_v1 = vsel %vm1067_vm5, %v2231_v9, %v2235_v48  ;;  %v1217_v5 = vrot.slane %v1215_v33, 1  ;;  %v1134_v9 = vor.u32 %v1133_v47, %v1129_v26 }
  0x9b   : > { %2289 = vrot.lane.b32.xlu0 %v2128_v41, %s3985_s21  ;;  %v372_v41 = vrot.slane %v370_v30, 7  ;;  %v1127_v12 = vsel %vm1067_vm5, %v1122_v49, %v1126_v6  ;;  %v1138_v30 = vrot.slane %v1136_v28, 1  ;;  %v798_v48 = vld [vmem:[#allocation2 + $0x3c] sm:$0xe]  ;;  %v1222_v33 = vrot.slane %v1220_v34, 1 }
  0x9c   : > { %2033 = vrot.lane.b32.xlu1 %v4436_v22, %s3984_s11  ;;  %v2395_v22 = vrot.slane %v3422_v37, 1  ;;  %v424_v25 = vor.u32 %v422_v18, %v421_v24  ;;  %v503_v4 = vsel %vm4079_vm6, %v421_v24, 0  ;;  %v771_v37 = vld [vmem:[#allocation2 + $0x9c] sm:$0xf]  ;;  %v3861_v18 = vld [vmem:[%s4075_s30 + $0x70] sm:$0xff]  }
  0x9d   : > { %v4522_v23 = vpop.permute.xlu0 %1260  ;;  %v3277_v35 = vcombine.low %v503_v4, %v503_v4  ;;  %v375_v60 = vor.u32 %v373_v44, %v372_v41  ;;  %v4556_v51 = vcombine.low %v771_v37, %v4542_v38  ;;  %v2771_v4 = vsel %vm2769_vm7, %v3856_v27, 0 }
  0x9e   : > { %v487_v53 = vsel %vm4079_vm6, 0, %v424_v25  ;;  %v2397_v24 = vsel %vm1340_vm2, %v2395_v22, %v2396_v3  ;;  %3638 = vmatpush3.bf16.msra.mxu0 %v2771_v4  ;;  %v496_v63 = vsel %vm4079_vm6, %v372_v41, 0  ;;  %3676 = vmatpush3.bf16.msra.mxu1 %v2771_v4  ;;  %v1354_v22 = vrot.slane %v4477_v29, 1 }
  0x9f   : > { %2291 = vrot.lane.b32.xlu0 %v2140_v61, %s3985_s21  ;;  %v3275_v54 = vcombine.low %v487_v53, %v487_v53  ;;  %v3276_v59 = vcombine.high %v487_v53, %v487_v53  ;;  %735 = vst.msk [vmem:[#allocation2 + $0xb0] sm:$0x1] %vm692_vm1, %v3277_v35  ;;  %5368 = vst [vmem:[#allocation6_spill] sm:$0xff] %v4556_v51  ;;  %v1227_v25 = vshll.u32 %v4556_v51, 16  ;;  %v426_v26 = vshrl.u32 %v3861_v18, 16 }
  0xa0   : > { %2035 = vrot.lane.b32.xlu1 %v4464_v2, %s3984_s11  ;;  %v3256_v3 = vcombine.low %v496_v63, %v496_v63  ;;  %v1139_v28 = vsel %vm1067_vm5, %v1134_v9, %v1138_v30  ;;  %v2399_v27 = vrot.slane %v4490_v45, 1  ;;  %v3321_v44 = vcombine.low %v798_v48, %v4484_v39  ;;  %v4593_v53 = vld [vmem:[#allocation2 + $0x40] sm:$0xf]  ;;  %v834_v30 = vld [vmem:[#allocation2 + $0x9c] sm:$0xf] }
  0xa1   : > { %733 = vst.msk [vmem:[#allocation2 + $0xa8] sm:$0xf] %vm689_vm0, %v3275_v54  ;;  %734 = vst.msk [vmem:[#allocation2 + $0xac] sm:$0xf] %vm689_vm0, %v3276_v59  ;;  %v1225_v47 = vshrl.u32 %v4556_v51, 16  ;;  %v1232_v29 = vshll.u32 %v4574_v42, 16  ;;  %v1355_v45 = vsel %vm1340_vm2, %v1353_v17, %v1354_v22 }
  0xa2   : > { %714 = vst.msk [vmem:[#allocation2 + $0x5c] sm:$0x1] %vm692_vm1, %v3256_v3  ;;  %v805_v54 = vld [vmem:[#allocation2 + $0x90] sm:$0xe]  ;;  %v428_v39 = vrot.slane %v426_v26, 7 }
  0xa3   : > { %v4540_v2 = vpop.permute.xlu1 %1517  ;;  %2417 = vrot.lane.b32.xlu0 %v2373_v50, %s3986_s23  ;;  %v480_v50 = vsel %vm4079_vm6, 0, %v375_v60  ;;  %v1356_v60 = vrot.slane %v3321_v44, 1  ;;  %v4611_v9 = vld [vmem:[#allocation2 + $0x4c] sm:$0xf] }
  0xa4   : > { %2305 = vrot.lane.b32.xlu1 %v2224_v19, %s3985_s21  ;;  %v3423_v19 = vcombine.low %v934_v57, %v4452_v56  ;;  %v3254_v62 = vcombine.low %v480_v50, %v480_v50  ;;  %v3255_v6 = vcombine.high %v480_v50, %v480_v50  ;;  %v1218_v56 = vor.u32 %v1217_v5, %v1213_v11  ;;  %v4613_v48 = vld [vmem:[#allocation2 + $0x44] ss:$0 sps:$4 sm:$0x11]  }
  0xa5   : > { %v4551_v61 = vpop.permute.xlu0 %1501  ;;  %v1229_v11 = vrot.slane %v1227_v25, 1  ;;  %v1234_v50 = vrot.slane %v1232_v29, 1  ;;  %v4620_v25 = vld [vmem:[#allocation2 + $0xa0] sm:$0xf] }
  0xa6   : > { %712 = vst.msk [vmem:[#allocation2 + $0x54] sm:$0xf] %vm689_vm0, %v3254_v62  ;;  %713 = vst.msk [vmem:[#allocation2 + $0x58] sm:$0xf] %vm689_vm0, %v3255_v6  ;;  %v2398_v35 = vrot.slane %v3423_v19, 1  ;;  %v1223_v41 = vsel %vm1067_vm5, %v1218_v56, %v1222_v33  ;;  %v3328_v19 = vcombine.low %v805_v54, %v4497_v32  ;;  %v429_v62 = vshll.u32 %v3861_v18, 16 }
  0xa7   : > { %1268 = vrot.lane.b32.xlu0 %v1127_v12, %s3980_s5  ;;  %v818_v12 = vld [vmem:[#allocation2 + $0x3c] sm:$0xf]  ;;  %v1230_v34 = vor.u32 %v1229_v11, %v1225_v47  ;;  %v1378_v18 = vrot.slane %v4535_v31, 1  ;;  %v3329_v33 = vcombine.low %v806_v10, %v4542_v38  ;;  %v3344_v31 = vcombine.low %v834_v30, %v4620_v25  ;;  %v4637_v29 = vld [vmem:[#allocation2 + $0x50] ss:$0 sps:$4 sm:$0x11]  }
  0xa8   : > { %2307 = vrot.lane.b32.xlu1 %v2236_v1, %s3985_s21  ;;  %v4569_v49 = vpop.permute.xlu1 %1519  ;;  %v2400_v59 = vsel %vm1340_vm2, %v2398_v35, %v2399_v27  ;;  %v1357_v1 = vrot.slane %v4512_v20, 1  ;;  %v3336_v5 = vcombine.low %v818_v12, %v4593_v53  ;;  %v431_v56 = vor.u32 %v429_v62, %v428_v39 }
  0xa9   : > { %v4580_v37 = vpop.permute.xlu0 %1503  ;;  %v1235_v4 = vsel %vm1067_vm5, %v1230_v34, %v1234_v50  ;;  %v1377_v63 = vrot.slane %v3328_v19, 1  ;;  %v1381_v35 = vrot.slane %v4574_v42, 1  ;;  %v1380_v27 = vrot.slane %v3329_v33, 1  ;;  %v4648_v34 = vld [vmem:[#allocation2 + $0xa4] ss:$0 sps:$4 sm:$0x11]  }
  0xaa   : > { %v1358_v20 = vsel %vm1340_vm2, %v1356_v60, %v1357_v1  ;;  %v1632_v32 = vshll.u32 %v3336_v5, 16  ;;  %v488_v22 = vsel %vm4079_vm6, 0, %v431_v56  ;;  %v1630_v44 = vshrl.u32 %v3336_v5, 16  ;;  %v862_v50 = vld [vmem:[#allocation2 + $0x3c] sm:$0xe] }
  0xab   : > { %2419 = vrot.lane.b32.xlu0 %v2376_v15, %s3986_s23  ;;  %v3279_v38 = vcombine.high %v488_v22, %v488_v22  ;;  %v1379_v47 = vsel %vm1340_vm2, %v1377_v63, %v1378_v18  ;;  %v504_v60 = vsel %vm4079_vm6, %v428_v39, 0  ;;  %v1728_v1 = vshll.u32 %v3344_v31, 16 }
  0xac   : > { %2433 = vrot.lane.b32.xlu1 %v2397_v24, %s3986_s23  ;;  %v820_v24 = vld [vmem:[#allocation2 + $0x48] sm:$0xf]  ;;  %v1634_v12 = vrot.slane %v1632_v32, 1  ;;  %v1382_v19 = vsel %vm1340_vm2, %v1380_v27, %v1381_v35  ;;  %v3368_v63 = vcombine.low %v862_v50, %v4593_v53  ;;  %v4664_v35 = vld [vmem:[#allocation2 + $0x4c] sm:$0xf] }
  0xad   : > { %v4598_v55 = vpop.permute.xlu0 %1391  ;;  %v3337_v17 = vcombine.low %v820_v24, %v4611_v9  ;;  %737 = vst.msk [vmem:[#allocation2 + $0xb8] sm:$0xf] %vm689_vm0, %v3279_v38  ;;  %v3280_v24 = vcombine.low %v504_v60, %v504_v60  ;;  %v1730_v33 = vrot.slane %v1728_v1, 1  ;;  %v1866_v1 = vrot.slane %v4613_v48, 1 }
  0xae   : > { %v4596_v57 = vpop.permute.xlu1 %1405  ;;  %v1635_v10 = vor.u32 %v1634_v12, %v1630_v44  ;;  %v1865_v60 = vrot.slane %v3368_v63, 1  ;;  %v4688_v63 = vld [vmem:[#allocation2 + $0x50] ss:$0 sps:$4 sm:$0x11]  }
  0xaf   : > { %1270 = vrot.lane.b32.xlu0 %v1139_v28, %s3980_s5  ;;  %v3278_v28 = vcombine.low %v488_v22, %v488_v22  ;;  %v1644_v11 = vshll.u32 %v3337_v17, 16  ;;  %v1642_v30 = vshrl.u32 %v3337_v17, 16  ;;  %738 = vst.msk [vmem:[#allocation2 + $0xbc] sm:$0x1] %vm692_vm1, %v3280_v24  ;;  %v863_v22 = vld [vmem:[#allocation2 + $0x48] sm:$0xe] }
  0xb0   : > { %1284 = vrot.lane.b32.xlu1 %v1223_v41, %s3980_s5  ;;  %v1637_v41 = vshll.u32 %v4613_v48, 16  ;;  %v3369_v53 = vcombine.low %v863_v22, %v4611_v9  ;;  %v2447_v48 = vsel %vm2445_vm8, %v4083_v14, %v4522_v23 }
  0xb1   : > { %v4609_v15 = vpop.permute.xlu0 %1901  ;;  %736 = vst.msk [vmem:[#allocation2 + $0xb4] sm:$0xf] %vm689_vm0, %v3278_v28  ;;  %v1646_v56 = vrot.slane %v1644_v11, 1  ;;  %v883_v28 = vld [vmem:[#allocation2 + $0x48] sm:$0xf] }
  0xb2   : > { %v4607_v6 = vpop.permute.xlu1 %1407  ;;  %v1639_v62 = vrot.slane %v1637_v41, 1  ;;  %v4667_v41 = vld [vmem:[#allocation2 + $0xb0] ss:$0 sps:$4 sm:$0x11]   ;;  %v1868_v22 = vrot.slane %v3369_v53, 1 }
  0xb3   : > { %1397 = vrot.lane.b32.xlu0 %v1355_v45, %s3979_s4  ;;  %v836_v45 = vld [vmem:[#allocation2 + $0xa8] sm:$0xf]  ;;  %v1647_v27 = vor.u32 %v1646_v56, %v1642_v30  ;;  %v1745_v30 = vshll.u32 %v4667_v41, 16  ;;  %v4700_v53 = vld [vmem:[#allocation2 + $0xac] sm:$0xf] }
  0xb4   : > { %2435 = vrot.lane.b32.xlu1 %v2400_v59, %s3986_s23  ;;  %v4644_v59 = vld [vmem:[#allocation2 + $0xac] sm:$0xf]  ;;  %v1640_v38 = vsel %vm1067_vm5, %v1635_v10, %v1639_v62  ;;  %v4762_v51 = vld [vmem:[#allocation2 + $0xb8] sm:$0xf] }
  0xb5   : > { %v4628_v26 = vpop.permute.xlu0 %1276  ;;  %v3345_v32 = vcombine.low %v836_v45, %v4644_v59  ;;  %v4675_v45 = vcombine.low %v883_v28, %v4664_v35 }
  0xb6   : > { %v4626_v3 = vpop.permute.xlu1 %1917 }
  0xb7   : > { %1399 = vrot.lane.b32.xlu0 %v1358_v20, %s3979_s4  ;;  %v1649_v20 = vshll.u32 %v4637_v29, 16  ;;  %v1740_v12 = vshll.u32 %v3345_v32, 16  ;;  %v1738_v62 = vshrl.u32 %v3345_v32, 16 }
  0xb8   : > { %1286 = vrot.lane.b32.xlu1 %v1235_v4, %s3980_s5  ;;  %v1733_v4 = vshll.u32 %v4648_v34, 16 }
  0xb9   : > { %v4640_v42 = vpop.permute.xlu0 %1773  ;;  %v1651_v44 = vrot.slane %v1649_v20, 1  ;;  %v1742_v24 = vrot.slane %v1740_v12, 1  ;;  %v899_v12 = vld [vmem:[#allocation2 + $0xa8] sm:$0xf] }
  0xba   : > { %v4642_v54 = vpop.permute.xlu1 %1262 }
  0xbb   : > { %1509 = vrot.lane.b32.xlu0 %v3336_v5, %s3981_s6  ;;  %v1726_v5 = vshrl.u32 %v3344_v31, 16  ;;  %v1652_v10 = vsel %vm1067_vm5, %v1647_v27, %v1651_v44  ;;  %v1743_v27 = vor.u32 %v1742_v24, %v1738_v62  ;;  %v1747_v44 = vrot.slane %v1745_v30, 1  ;;  %v4723_v30 = vld [vmem:[#allocation2 + $0x54] sm:$0xe] }
  0xbc   : > { %1413 = vrot.lane.b32.xlu1 %v1379_v47, %s3979_s4  ;;  %v2149_v62 = vshll.u32 %v4688_v63, 16 }
  0xbd   : > { %v4655_v39 = vpop.permute.xlu0 %1775  ;;  %v1731_v50 = vor.u32 %v1730_v33, %v1726_v5  ;;  %v871_v5 = vld [vmem:[#allocation2 + $0xa8] sm:$0xe]  ;;  %v885_v33 = vld [vmem:[#allocation2 + $0x54] sm:$0xf] }
  0xbe   : > { %v4657_v18 = vpop.permute.xlu1 %1278 }
  0xbf   : > { %1511 = vrot.lane.b32.xlu0 %v3337_v17, %s3981_s6  ;;  %v870_v17 = vld [vmem:[#allocation2 + $0x9c] sm:$0xe] }
  0xc0   : > { %1415 = vrot.lane.b32.xlu1 %v1382_v19, %s3979_s4  ;;  %v1735_v19 = vrot.slane %v1733_v4, 1  ;;  %v3376_v9 = vcombine.low %v870_v17, %v4620_v25  ;;  %v1867_v25 = vsel %vm1340_vm2, %v1865_v60, %v1866_v1  ;;  %v4696_v4 = vld [vmem:[#allocation2 + $0x58] sm:$0xf]  ;;  %v1890_v60 = vrot.slane %v4648_v34, 1 }
  0xc1   : > { %v4669_v47 = vpop.permute.xlu0 %1903  ;;  %v2480_v1 = vsel %vm2478_vm9, %v2447_v48, %v4487_v40  ;;  %v4718_v34 = vcombine.low %v899_v12, %v4700_v53 }
  0xc2   : > { %v4671_v11 = vpop.permute.xlu1 %1789  ;;  %v1736_v28 = vsel %vm1067_vm5, %v1731_v50, %v1735_v19  ;;  %v1889_v17 = vrot.slane %v3376_v9, 1  ;;  %v4711_v50 = vcombine.low %v885_v33, %v4696_v4  ;;  %v2142_v19 = vshrl.u32 %v4675_v45, 16 }
  0xc3   : > { %1781 = vrot.lane.b32.xlu0 %v1640_v38, %s3983_s8  ;;  %v1869_v38 = vrot.slane %v4637_v29, 1  ;;  %v3377_v29 = vcombine.low %v871_v5, %v4644_v59  ;;  %v1748_v59 = vsel %vm1067_vm5, %v1743_v27, %v1747_v44  ;;  %v3882_v5 = vld [vmem:[%s4075_s30 + $0x78] sm:$0xff]   ;;  %v2151_v44 = vrot.slane %v2149_v62, 1 }
  0xc4   : > { %1525 = vrot.lane.b32.xlu1 %v3344_v31, %s3981_s6  ;;  %v2144_v31 = vshll.u32 %v4675_v45, 16  ;;  %v2240_v12 = vshll.u32 %v4718_v34, 16 }
  0xc5   : > { %v4683_v56 = vpop.permute.xlu0 %2013  ;;  %v1870_v40 = vsel %vm1340_vm2, %v1868_v22, %v1869_v38  ;;  %v2156_v22 = vshll.u32 %v4711_v50, 16  ;;  %v1892_v33 = vrot.slane %v3377_v29, 1  ;;  %v4748_v29 = vld [vmem:[#allocation2 + $0xb0] ss:$0 sps:$4 sm:$0x11]  }
  0xc6   : > { %v4685_v20 = vpop.permute.xlu1 %1791  ;;  %v901_v38 = vld [vmem:[#allocation2 + $0xb4] sm:$0xf] }
  0xc7   : > { %1783 = vrot.lane.b32.xlu0 %v1652_v10, %s3983_s8  ;;  %v2146_v10 = vrot.slane %v2144_v31, 1  ;;  %v1891_v31 = vsel %vm1340_vm2, %v1889_v17, %v1890_v60 }
  0xc8   : > { %1527 = vrot.lane.b32.xlu1 %v3345_v32, %s3981_s6  ;;  %v927_v32 = vld [vmem:[#allocation2 + $0x48] sm:$0xe] }
  0xc9   : > { %v4702_v14 = vpop.permute.xlu0 %2015  ;;  %v3416_v24 = vcombine.low %v927_v32, %v4664_v35  ;;  %v4733_v35 = vld [vmem:[#allocation2 + $0x5c] ss:$0 sps:$4 sm:$0x11]   ;;  %v2147_v27 = vor.u32 %v2146_v10, %v2142_v19  ;;  %v757_v32 = vld [vmem:[#allocation2 + $0x48] sm:$0xf]  ;;  %v2463_v19 = vsel %vm2445_vm8, %v4150_v46, %v4628_v26  ;;  %v2449_v10 = vsel %vm2445_vm8, %v4153_v52, %v4642_v54 }
  0xca   : > { %v4704_v23 = vpop.permute.xlu1 %1919  ;;  %v2238_v26 = vshrl.u32 %v4718_v34, 16  ;;  %v2242_v54 = vrot.slane %v2240_v12, 1 }
  0xcb   : > { %1909 = vrot.lane.b32.xlu0 %v1867_v25, %s3982_s7  ;;  %v2513_v25 = vsel %vm2511_vm10, %v2480_v1, %v4551_v61  ;;  %v4740_v61 = vld [vmem:[#allocation2 + $0x4c] sm:$0xf]  ;;  %v4745_v60 = vrot.slane %v3416_v24, 1  ;;  %v2161_v1 = vshll.u32 %v4733_v35, 16 }
  0xcc   : > { %1797 = vrot.lane.b32.xlu1 %v1736_v28, %s3983_s8  ;;  %v1893_v28 = vrot.slane %v4667_v41, 1  ;;  %v2546_v17 = vsel %vm2544_vm11, %v2513_v25, %v4640_v42  ;;  %v2154_v41 = vshrl.u32 %v4711_v50, 16  ;;  %v433_v42 = vshrl.u32 %v3882_v5, 16 }
  0xcd   : > { %v2286_v9 = vpop.permute.xlu0 %2285  ;;  %v2158_v25 = vrot.slane %v2156_v22, 1  ;;  %v4765_v46 = vcombine.low %v757_v32, %v4740_v61  ;;  %v2579_v52 = vsel %vm2577_vm12, %v2546_v17, %v4609_v15  ;;  %v2496_v22 = vsel %vm2478_vm9, %v2463_v19, %v4596_v57 }
  0xce   : > { %v4725_v48 = vpop.permute.xlu1 %2029  ;;  %v1894_v24 = vsel %vm1340_vm2, %v1892_v33, %v1893_v28  ;;  %v2482_v33 = vsel %vm2478_vm9, %v2449_v10, %v4598_v55  ;;  %v2612_v28 = vsel %vm2610_vm13, %v2579_v52, %v4683_v56  ;;  %v2245_v15 = vshll.u32 %v4748_v29, 16  ;;  %v4787_v10 = vld [vmem:[#allocation2 + $0x50] ss:$0 sps:$4 sm:$0x11]  }
  0xcf   : > { %1911 = vrot.lane.b32.xlu0 %v1870_v40, %s3982_s7  ;;  %v2645_v32 = vsel %vm2643_vm14, %v2612_v28, %v2286_v9  ;;  %v2159_v19 = vor.u32 %v2158_v25, %v2154_v41  ;;  %v2163_v55 = vrot.slane %v2161_v1, 1  ;;  %v1143_v56 = vshll.u32 %v4765_v46, 16  ;;  %v4803_v25 = vld [vmem:[#allocation2 + $0x58] sm:$0xf] }
  0xd0   : > { %1799 = vrot.lane.b32.xlu1 %v1748_v59, %s3983_s8  ;;  %v436_v59 = vshll.u32 %v3882_v5, 16  ;;  %v435_v5 = vrot.slane %v433_v42, 7  ;;  %v2515_v9 = vsel %vm2511_vm10, %v2482_v33, %v4580_v37  ;;  %v2529_v52 = vsel %vm2511_vm10, %v2496_v22, %v4540_v2  ;;  %v773_v2 = vld [vmem:[#allocation2 + $0xa8] sm:$0xf] }
  0xd1   : > { %v4756_v62 = vpop.permute.xlu0 %2287  ;;  %v2152_v37 = vsel %vm1067_vm5, %v2147_v27, %v2151_v44  ;;  %v2548_v27 = vsel %vm2544_vm11, %v2515_v9, %v4655_v39  ;;  %v2164_v44 = vsel %vm1067_vm5, %v2159_v19, %v2163_v55  ;;  %v935_v39 = vld [vmem:[#allocation2 + $0xa8] sm:$0xe] }
  0xd2   : > { %v4758_v40 = vpop.permute.xlu1 %2031  ;;  %v438_v12 = vor.u32 %v436_v59, %v435_v5  ;;  %v505_v42 = vsel %vm4079_vm6, %v435_v5, 0  ;;  %v2562_v59 = vsel %vm2544_vm11, %v2529_v52, %v4671_v11  ;;  %v4805_v5 = vld [vmem:[#allocation2 + $0xac] sm:$0xf]  ;;  %v1141_v11 = vshrl.u32 %v4765_v46, 16 }
  0xd3   : > { %2021 = vrot.lane.b32.xlu0 %v4675_v45, %s3984_s11  ;;  %v3283_v1 = vcombine.low %v505_v42, %v505_v42  ;;  %v1148_v42 = vshll.u32 %v4787_v10, 16 }
  0xd4   : > { %1925 = vrot.lane.b32.xlu1 %v1891_v31, %s3982_s7  ;;  %v4782_v31 = vcombine.low %v901_v38, %v4762_v51  ;;  %v759_v38 = vld [vmem:[#allocation2 + $0x54] sm:$0xf]  ;;  %v489_v41 = vsel %vm4079_vm6, 0, %v438_v12  ;;  %v1145_v12 = vrot.slane %v1143_v56, 1 }
  0xd5   : > { %v2414_v45 = vpop.permute.xlu0 %2413  ;;  %v3282_v22 = vcombine.high %v489_v41, %v489_v41  ;;  %741 = vst.msk [vmem:[#allocation2 + $0xc8] sm:$0x1] %vm692_vm1, %v3283_v1  ;;  %v4852_v1 = vld [vmem:[#allocation2 + $0x5c] ss:$0 sps:$4 sm:$0x11]  }
  0xd6   : > { %v2302_v17 = vpop.permute.xlu1 %2301  ;;  %v2678_v57 = vsel %vm2676_vm15, %v2645_v32, %v2414_v45  ;;  %v2252_v13 = vshll.u32 %v4782_v31, 16  ;;  %v2243_v32 = vor.u32 %v2242_v54, %v2238_v26  ;;  %v2247_v45 = vrot.slane %v2245_v15, 1 }
  0xd7   : > { %2023 = vrot.lane.b32.xlu0 %v4711_v50, %s3984_s11  ;;  %3639 = vmatprep.mubr.msk.bf16.mxu0 %vm2736_vm3, %v2678_v57  ;;  %v3281_v50 = vcombine.low %v489_v41, %v489_v41  ;;  %740 = vst.msk [vmem:[#allocation2 + $0xc4] sm:$0xf] %vm689_vm0, %v3282_v22  ;;  %v2465_v26 = vsel %vm2445_vm8, %v4156_v58, %v4657_v18  ;;  %v2250_v58 = vshrl.u32 %v4782_v31, 16  ;;  %v4868_v22 = vld [vmem:[#allocation2 + $0xb0] ss:$0 sps:$4 sm:$0x11]  }
  0xd8   : > { %1927 = vrot.lane.b32.xlu1 %v1894_v24, %s3982_s7  ;;  %v4813_v24 = vld [vmem:[#allocation2 + $0xbc] ss:$0 sps:$4 sm:$0x11]   ;;  %v2581_v54 = vsel %vm2577_vm12, %v2548_v27, %v4669_v47  ;;  %v2595_v15 = vsel %vm2577_vm12, %v2562_v59, %v4626_v3  ;;  %v4831_v57 = vcombine.low %v759_v38, %v4803_v25  ;;  %v4841_v18 = vcombine.low %v773_v2, %v4805_v5 }
  0xd9   : > { %v4807_v33 = vpop.permute.xlu0 %1264  ;;  %739 = vst.msk [vmem:[#allocation2 + $0xc0] sm:$0xf] %vm689_vm0, %v3281_v50  ;;  %v2614_v19 = vsel %vm2610_vm13, %v2581_v54, %v4702_v14  ;;  %v2628_v55 = vsel %vm2610_vm13, %v2595_v15, %v4725_v48  ;;  %v2254_v52 = vrot.slane %v2252_v13, 1  ;;  %v2257_v14 = vshll.u32 %v4813_v24, 16 }
  0xda   : > { %v4809_v28 = vpop.permute.xlu1 %2303  ;;  %v2647_v3 = vsel %vm2643_vm14, %v2614_v19, %v4756_v62  ;;  %v2661_v47 = vsel %vm2643_vm14, %v2628_v55, %v2302_v17  ;;  %v2498_v48 = vsel %vm2478_vm9, %v2465_v26, %v4607_v6  ;;  %v1146_v62 = vor.u32 %v1145_v12, %v1141_v11  ;;  %v4881_v12 = vld [vmem:[#allocation2 + $0xb8] sm:$0xf]  ;;  %v936_v19 = vld [vmem:[#allocation2 + $0xb4] sm:$0xe] }
  0xdb   : > { %2293 = vrot.lane.b32.xlu0 %v2152_v37, %s3985_s21  ;;  %v1150_v17 = vrot.slane %v1148_v42, 1  ;;  %v5369_v59 = vcombine.low %v4723_v30, %v4696_v4  ;;  %v1155_v6 = vshll.u32 %v4831_v57, 16  ;;  %v2248_v50 = vsel %vm1067_vm5, %v2243_v32, %v2247_v45  ;;  %v775_v45 = vld [vmem:[#allocation2 + $0xb4] sm:$0xf] }
  0xdc   : > { %2037 = vrot.lane.b32.xlu1 %v4718_v34, %s3984_s11  ;;  %v3424_v34 = vcombine.low %v935_v39, %v4700_v53  ;;  %v5370_v53 = vrot.slane %v4688_v63, 1  ;;  %v1239_v13 = vshll.u32 %v4841_v18, 16  ;;  %v2531_v4 = vsel %vm2511_vm10, %v2498_v48, %v4569_v49 }
  0xdd   : > { %v2416_v56 = vpop.permute.xlu0 %2415  ;;  %v2380_v37 = vrot.slane %v5369_v59, 1  ;;  %v2259_v27 = vrot.slane %v2257_v14, 1  ;;  %v2381_v63 = vrot.slane %v4733_v35, 1  ;;  %v1160_v32 = vshll.u32 %v4852_v1, 16 }
  0xde   : > { %v2430_v9 = vpop.permute.xlu1 %2429  ;;  %v2680_v38 = vsel %vm2676_vm15, %v2647_v3, %v2416_v56  ;;  %v2379_v2 = vsel %vm1340_vm2, %v4745_v60, %v5370_v53  ;;  %v2564_v60 = vsel %vm2544_vm11, %v2531_v4, %v4685_v20  ;;  %v1151_v42 = vsel %vm1067_vm5, %v1146_v62, %v1150_v17  ;;  %v799_v56 = vld [vmem:[#allocation2 + $0x48] sm:$0xe]  ;;  %v822_v4 = vld [vmem:[#allocation2 + $0x54] sm:$0xf] }
  0xdf   : > { %v2694_v41 = vsel %vm2676_vm15, %v2661_v47, %v2430_v9  ;;  %2295 = vrot.lane.b32.xlu0 %v2164_v44, %s3985_s21  ;;  %3640 = vmatmul.mubr.msk.bf16.vlgmr.msra.gmra.mrb[0].mxu0 %vm2736_vm3, %v2680_v38  ;;  %v2401_v44 = vrot.slane %v3424_v34, 1  ;;  %v2597_v49 = vsel %vm2577_vm12, %v2564_v60, %v4704_v23  ;;  %v1153_v26 = vshrl.u32 %v4831_v57, 16 }
  0xe0   : > { %2039 = vrot.lane.b32.xlu1 %v4782_v31, %s3984_s11  ;;  %3655 = vmatprep.mubr.msk.bf16.mxu1 %vm2736_vm3, %v2694_v41  ;;  %v2255_v31 = vor.u32 %v2254_v52, %v2250_v58  ;;  %v1157_v54 = vrot.slane %v1155_v6, 1  ;;  %v2630_v35 = vsel %vm2610_vm13, %v2597_v49, %v4758_v40  ;;  %v1237_v20 = vshrl.u32 %v4841_v18, 16  ;;  %v800_v41 = vld [vmem:[#allocation2 + $0x54] sm:$0xe] }
  0xe1   : > { %v4873_v30 = vpop.permute.xlu0 %1266  ;;  %v1241_v15 = vrot.slane %v1239_v13, 1  ;;  %v1244_v39 = vshll.u32 %v4868_v22, 16  ;;  %v2663_v23 = vsel %vm2643_vm14, %v2630_v35, %v4809_v28  ;;  %v2402_v47 = vrot.slane %v4748_v29, 1  ;;  %v4914_v6 = vld [vmem:[#allocation2 + $0xbc] ss:$0 sps:$4 sm:$0x11]  }
  0xe2   : > { %v4875_v11 = vpop.permute.xlu1 %1280  ;;  %v2260_v3 = vsel %vm1067_vm5, %v2255_v31, %v2259_v27  ;;  %v4900_v40 = vcombine.low %v775_v45, %v4881_v12  ;;  %v2382_v28 = vsel %vm1340_vm2, %v2380_v37, %v2381_v63  ;;  %v1158_v52 = vor.u32 %v1157_v54, %v1153_v26  ;;  %v807_v45 = vld [vmem:[#allocation2 + $0xa8] sm:$0xe] }
  0xe3   : > { %2421 = vrot.lane.b32.xlu0 %v2379_v2, %s3986_s23  ;;  %v1162_v14 = vrot.slane %v1160_v32, 1  ;;  %v3425_v48 = vcombine.low %v936_v19, %v4762_v51  ;;  %v1242_v34 = vor.u32 %v1241_v15, %v1237_v20  ;;  %v1246_v29 = vrot.slane %v1244_v39, 1  ;;  %v4930_v32 = vld [vmem:[#allocation2 + $0x58] sm:$0xf]  ;;  %v4943_v19 = vld [vmem:[#allocation2 + $0x64] sm:$0xf] }
  0xe4   : > { %2309 = vrot.lane.b32.xlu1 %v2248_v50, %s3985_s21  ;;  %v3322_v38 = vcombine.low %v799_v56, %v4740_v61  ;;  %v2403_v59 = vsel %vm1340_vm2, %v2401_v44, %v2402_v47  ;;  %v1251_v37 = vshll.u32 %v4900_v40, 16  ;;  %v3323_v53 = vcombine.low %v800_v41, %v4803_v25 }
  0xe5   : > { %v4895_v55 = vpop.permute.xlu0 %1393  ;;  %v1163_v51 = vsel %vm1067_vm5, %v1158_v52, %v1162_v14  ;;  %v1247_v61 = vsel %vm1067_vm5, %v1242_v34, %v1246_v29  ;;  %v1360_v50 = vrot.slane %v4787_v10, 1  ;;  %v2404_v13 = vrot.slane %v3425_v48, 1  ;;  %v838_v34 = vld [vmem:[#allocation2 + $0xb4] sm:$0xf]  ;;  %v4958_v29 = vld [vmem:[#allocation2 + $0xb8] sm:$0xf] }
  0xe6   : > { %v2432_v58 = vpop.permute.xlu1 %2431  ;;  %v1359_v2 = vrot.slane %v3322_v38, 1  ;;  %v2405_v63 = vrot.slane %v4813_v24, 1  ;;  %v1249_v60 = vshrl.u32 %v4900_v40, 16  ;;  %v1253_v44 = vrot.slane %v1251_v37, 1 }
  0xe7   : > { %v2696_v9 = vsel %vm2676_vm15, %v2663_v23, %v2432_v58  ;;  %1272 = vrot.lane.b32.xlu0 %v1151_v42, %s3980_s5  ;;  %v1256_v25 = vshll.u32 %v4914_v6, 16  ;;  %v1362_v49 = vrot.slane %v3323_v53, 1  ;;  %v1363_v42 = vrot.slane %v4852_v1, 1  ;;  %v824_v23 = vld [vmem:[#allocation2 + $0x60] sm:$0xf] }
  0xe8   : > { %3656 = vmatmul.mubr.msk.bf16.vlgmr.msra.gmra.mrb[0].mxu1 %vm2736_vm3, %v2696_v9  ;;  %2311 = vrot.lane.b32.xlu1 %v2260_v3, %s3985_s21  ;;  %v1361_v10 = vsel %vm1340_vm2, %v1359_v2, %v1360_v50  ;;  %v3338_v26 = vcombine.low %v822_v4, %v4930_v32  ;;  %v2406_v35 = vsel %vm1340_vm2, %v2404_v13, %v2405_v63  ;;  %v808_v58 = vld [vmem:[#allocation2 + $0xb4] sm:$0xe]  ;;  %v4946_v3 = vld [vmem:[#allocation2 + $0x5c] ss:$0 sps:$4 sm:$0x11]   ;;  %v1384_v14 = vrot.slane %v4868_v22, 1 }
  0xe9   : > { %v4909_v62 = vpop.permute.xlu0 %1395  ;;  %v1254_v20 = vor.u32 %v1253_v44, %v1249_v60  ;;  %v1258_v15 = vrot.slane %v1256_v25, 1  ;;  %v3330_v39 = vcombine.low %v807_v45, %v4805_v5  ;;  %v1364_v1 = vsel %vm1340_vm2, %v1362_v49, %v1363_v42  ;;  %v4963_v37 = vld [vmem:[#allocation2 + $0x68] ss:$0 sps:$4 sm:$0x11]   ;;  %v840_v13 = vld [vmem:[#allocation2 + $0xc0] sm:$0xf] }
  0xea   : > { %v4911_v17 = vpop.permute.xlu1 %1282  ;;  %v3339_v47 = vcombine.low %v824_v23, %v4943_v19  ;;  %v1656_v56 = vshll.u32 %v3338_v26, 16  ;;  %v3331_v48 = vcombine.low %v808_v58, %v4881_v12  ;;  %v1661_v38 = vshll.u32 %v4946_v3, 16  ;;  %v4972_v4 = vld [vmem:[#allocation2 + $0xc4] sm:$0xf]  ;;  %v864_v60 = vld [vmem:[#allocation2 + $0x54] sm:$0xe] }
  0xeb   : > { %2423 = vrot.lane.b32.xlu0 %v2382_v28, %s3986_s23  ;;  %v1259_v5 = vsel %vm1067_vm5, %v1254_v20, %v1258_v15  ;;  %v1383_v52 = vrot.slane %v3330_v39, 1  ;;  %v1654_v41 = vshrl.u32 %v3338_v26, 16  ;;  %v1387_v2 = vrot.slane %v4914_v6, 1  ;;  %v4977_v49 = vld [vmem:[#allocation2 + $0xbc] ss:$0 sps:$4 sm:$0x11]  }
  0xec   : > { %2437 = vrot.lane.b32.xlu1 %v2403_v59, %s3986_s23  ;;  %v1658_v59 = vrot.slane %v1656_v56, 1  ;;  %v1386_v12 = vrot.slane %v3331_v48, 1  ;;  %v3346_v50 = vcombine.low %v838_v34, %v4958_v29  ;;  %v1663_v63 = vrot.slane %v1661_v38, 1  ;;  %v865_v56 = vld [vmem:[#allocation2 + $0x60] sm:$0xe] }
  0xed   : > { %v4923_v31 = vpop.permute.xlu0 %1505  ;;  %v1385_v22 = vsel %vm1340_vm2, %v1383_v52, %v1384_v14  ;;  %v1666_v25 = vshrl.u32 %v3339_v47, 16  ;;  %v3347_v20 = vcombine.low %v840_v13, %v4972_v4  ;;  %v3370_v15 = vcombine.low %v864_v60, %v4930_v32  ;;  %v4994_v34 = vld [vmem:[#allocation2 + $0xc8] ss:$0 sps:$4 sm:$0x11]   ;;  %v887_v38 = vld [vmem:[#allocation2 + $0x60] sm:$0xf] }
  0xee   : > { %v4925_v27 = vpop.permute.xlu1 %1409  ;;  %v1659_v44 = vor.u32 %v1658_v59, %v1654_v41  ;;  %v1750_v14 = vshrl.u32 %v3346_v50, 16  ;;  %v3371_v32 = vcombine.low %v865_v56, %v4943_v19  ;;  %v1769_v19 = vshll.u32 %v4994_v34, 16 }
  0xef   : > { %1274 = vrot.lane.b32.xlu0 %v1163_v51, %s3980_s5  ;;  %v1668_v51 = vshll.u32 %v3339_v47, 16  ;;  %v1871_v59 = vrot.slane %v3370_v15, 1  ;;  %v1762_v60 = vshrl.u32 %v3347_v20, 16  ;;  %v5014_v15 = vld [vmem:[#allocation2 + $0x70] sm:$0xf] }
  0xf0   : > { %1288 = vrot.lane.b32.xlu1 %v1247_v61, %s3980_s5  ;;  %v1664_v39 = vsel %vm1067_vm5, %v1659_v44, %v1663_v63  ;;  %v1771_v56 = vrot.slane %v1769_v19, 1 }
  0xf1   : > { %v4937_v24 = vpop.permute.xlu0 %1507  ;;  %v1670_v45 = vrot.slane %v1668_v51, 1  ;;  %v1872_v51 = vrot.slane %v4946_v3, 1 }
  0xf2   : > { %v4939_v54 = vpop.permute.xlu1 %1411 }
  0xf3   : > { %1401 = vrot.lane.b32.xlu0 %v1361_v10, %s3979_s4  ;;  %v1673_v10 = vshll.u32 %v4963_v37, 16  ;;  %v1671_v23 = vor.u32 %v1670_v45, %v1666_v25  ;;  %v872_v25 = vld [vmem:[#allocation2 + $0xb4] sm:$0xe]  ;;  %v1873_v3 = vsel %vm1340_vm2, %v1871_v59, %v1872_v51  ;;  %v1874_v45 = vrot.slane %v3371_v32, 1 }
  0xf4   : > { %2439 = vrot.lane.b32.xlu1 %v2406_v35, %s3986_s23  ;;  %v1388_v35 = vsel %vm1340_vm2, %v1386_v12, %v1387_v2  ;;  %v5001_v12 = vld [vmem:[#allocation2 + $0x64] sm:$0xf]  ;;  %v1896_v32 = vrot.slane %v4977_v49, 1 }
  0xf5   : > { %v4951_v9 = vpop.permute.xlu0 %1777  ;;  %v1675_v58 = vrot.slane %v1673_v10, 1  ;;  %v1875_v10 = vrot.slane %v4963_v37, 1 }
  0xf6   : > { %v4953_v28 = vpop.permute.xlu1 %1521 }
  0xf7   : > { %1403 = vrot.lane.b32.xlu0 %v1364_v1, %s3979_s4  ;;  %v1757_v1 = vshll.u32 %v4977_v49, 16  ;;  %v1676_v41 = vsel %vm1067_vm5, %v1671_v23, %v1675_v58 }
  0xf8   : > { %1290 = vrot.lane.b32.xlu1 %v1259_v5, %s3980_s5 }
  0xf9   : > { %v4965_v53 = vpop.permute.xlu0 %1779 }
  0xfa   : > { %v4967_v61 = vpop.permute.xlu1 %1523 }
  0xfb   : > { %1513 = vrot.lane.b32.xlu0 %v3338_v26, %s3981_s6  ;;  %v1752_v26 = vshll.u32 %v3346_v50, 16 }
  0xfc   : > { %1417 = vrot.lane.b32.xlu1 %v1385_v22, %s3979_s4  ;;  %v1759_v22 = vrot.slane %v1757_v1, 1 }
  0xfd   : > { %v4979_v42 = vpop.permute.xlu0 %1905  ;;  %v1754_v48 = vrot.slane %v1752_v26, 1  ;;  %v889_v26 = vld [vmem:[#allocation2 + $0x6c] sm:$0xf] }
  0xfe   : > { %v4981_v6 = vpop.permute.xlu1 %1793  ;;  %v3387_v37 = vcombine.low %v889_v26, %v5014_v15  ;;  %v1899_v26 = vrot.slane %v4994_v34, 1 }
  0xff   : > { %1515 = vrot.lane.b32.xlu0 %v3339_v47, %s3981_s6  ;;  %v1764_v47 = vshll.u32 %v3347_v20, 16  ;;  %v1755_v63 = vor.u32 %v1754_v48, %v1750_v14  ;;  %v873_v14 = vld [vmem:[#allocation2 + $0xc0] sm:$0xe] }
 0x100   : > { %1419 = vrot.lane.b32.xlu1 %v1388_v35, %s3979_s4  ;;  %v3378_v35 = vcombine.low %v872_v25, %v4958_v29  ;;  %v1876_v29 = vsel %vm1340_vm2, %v1874_v45, %v1875_v10  ;;  %v3379_v51 = vcombine.low %v873_v14, %v4972_v4  ;;  %v5039_v25 = vld [vmem:[#allocation2 + $0x74] ss:$0 sps:$4 sm:$0x11]   ;;  %s3215_s4 = sshll.u32 %s199_s28, 7 }
 0x101   : > { %v4990_v5 = vpop.permute.xlu0 %1907  ;;  %v1766_v44 = vrot.slane %v1764_v47, 1  ;;  %v1760_v58 = vsel %vm1067_vm5, %v1755_v63, %v1759_v22  ;;  %v903_v63 = vld [vmem:[#allocation2 + $0xc0] sm:$0xf]  ;;  %v2185_v34 = vshll.u32 %v5039_v25, 16 }
 0x102   : > { %v4992_v52 = vpop.permute.xlu1 %1795  ;;  %v1895_v47 = vrot.slane %v3378_v35, 1 }
 0x103   : > { %1785 = vrot.lane.b32.xlu0 %v1664_v39, %s3983_s8  ;;  %v1767_v1 = vor.u32 %v1766_v44, %v1762_v60  ;;  %v5033_v60 = vld [vmem:[#allocation2 + $0xc4] sm:$0xf]  ;;  %v2451_v44 = vsel %vm2445_vm8, %v4229_v36, %v4807_v33  ;;  %v1898_v33 = vrot.slane %v3379_v51, 1 }
 0x104   : > { %1529 = vrot.lane.b32.xlu1 %v3346_v50, %s3981_s6  ;;  %v3386_v50 = vcombine.low %v887_v38, %v5001_v12  ;;  %v2484_v45 = vsel %vm2478_vm9, %v2451_v44, %v4895_v55  ;;  %v1897_v4 = vsel %vm1340_vm2, %v1895_v47, %v1896_v32  ;;  %v929_v32 = vld [vmem:[#allocation2 + $0x60] sm:$0xe] }
 0x105   : > { %v5003_v2 = vpop.permute.xlu0 %2017  ;;  %v1772_v59 = vsel %vm1067_vm5, %v1767_v1, %v1771_v56  ;;  %v2517_v10 = vsel %vm2511_vm10, %v2484_v45, %v4923_v31  ;;  %v905_v1 = vld [vmem:[#allocation2 + $0xcc] sm:$0xf]  ;;  %v5055_v56 = vld [vmem:[#allocation2 + $0xd0] sm:$0xf] }
 0x106   : > { %v5005_v13 = vpop.permute.xlu1 %1921  ;;  %v2168_v48 = vshll.u32 %v3386_v50, 16  ;;  %v2166_v19 = vshrl.u32 %v3386_v50, 16  ;;  %v2550_v55 = vsel %vm2544_vm11, %v2517_v10, %v4951_v9  ;;  %v3395_v9 = vcombine.low %v905_v1, %v5055_v56 }
 0x107   : > { %1787 = vrot.lane.b32.xlu0 %v1676_v41, %s3983_s8  ;;  %v2583_v31 = vsel %vm2577_vm12, %v2550_v55, %v4979_v42  ;;  %v2453_v42 = vsel %vm2445_vm8, %v4279_v21, %v4873_v30  ;;  %v5097_v55 = vld [vmem:[#allocation2 + $0xd4] ss:$0 sps:$4 sm:$0x11]  }
 0x108   : > { %1531 = vrot.lane.b32.xlu1 %v3347_v20, %s3981_s6  ;;  %v5021_v20 = vld [vmem:[#allocation2 + $0x68] ss:$0 sps:$4 sm:$0x11]   ;;  %v2170_v49 = vrot.slane %v2168_v48, 1  ;;  %v2178_v48 = vshrl.u32 %v3387_v37, 16  ;;  %v2616_v51 = vsel %vm2610_vm13, %v2583_v31, %v5003_v2  ;;  %v2486_v10 = vsel %vm2478_vm9, %v2453_v42, %v4909_v62  ;;  %s5255_s6 = scalar_lea.vmem [#allocation3], %s3215_s4 }
 0x109   : > { %v5016_v39 = vpop.permute.xlu0 %2019  ;;  %v2173_v22 = vshll.u32 %v5021_v20, 16  ;;  %v2281_v42 = vshll.u32 %v5097_v55, 16 }
 0x10a   : > { %v5018_v23 = vpop.permute.xlu1 %1923 }
 0x10b   : > { %1913 = vrot.lane.b32.xlu0 %v1873_v3, %s3982_s7  ;;  %v2180_v3 = vshll.u32 %v3387_v37, 16  ;;  %v2175_v14 = vrot.slane %v2173_v22, 1  ;;  %v5067_v22 = vld [vmem:[#allocation2 + $0xc8] ss:$0 sps:$4 sm:$0x11]  }
 0x10c   : > { %1801 = vrot.lane.b32.xlu1 %v1760_v58, %s3983_s8  ;;  %v5053_v58 = vcombine.low %v903_v63, %v5033_v60 }
 0x10d   : > { %v2290_v38 = vpop.permute.xlu0 %2289  ;;  %v2182_v47 = vrot.slane %v2180_v3, 1  ;;  %v3418_v3 = vcombine.low %v929_v32, %v5001_v12 }
 0x10e   : > { %v5028_v41 = vpop.permute.xlu1 %2033  ;;  %v2262_v1 = vshrl.u32 %v5053_v58, 16 }
 0x10f   : > { %1915 = vrot.lane.b32.xlu0 %v1876_v29, %s3982_s7  ;;  %v2171_v29 = vor.u32 %v2170_v49, %v2166_v19  ;;  %v1900_v19 = vsel %vm1340_vm2, %v1898_v33, %v1899_v26  ;;  %v2264_v49 = vshll.u32 %v5053_v58, 16  ;;  %v2183_v30 = vor.u32 %v2182_v47, %v2178_v48 }
 0x110   : > { %1803 = vrot.lane.b32.xlu1 %v1772_v59, %s3983_s8  ;;  %v930_v59 = vld [vmem:[#allocation2 + $0x6c] sm:$0xe]  ;;  %v2276_v33 = vshll.u32 %v3395_v9, 16  ;;  %v2383_v48 = vrot.slane %v3418_v3, 1  ;;  %v2274_v47 = vshrl.u32 %v3395_v9, 16  ;;  %s3109_s8 = sshll.u32 %s5255_s6, 4  ;;  %s5306_s8 = int_to_ptr.vmem [resolvable:$true] %s3109_s8 }
 0x111   : > { %v5047_v35 = vpop.permute.xlu0 %2291  ;;  %v3419_v45 = vcombine.low %v930_v59, %v5014_v15  ;;  %v2176_v21 = vsel %vm1067_vm5, %v2171_v29, %v2175_v14  ;;  %v2269_v15 = vshll.u32 %v5067_v22, 16  ;;  %v2266_v62 = vrot.slane %v2264_v49, 1  ;;  %s3898_s18 = scalar_lea.vmem %s5306_s8, 2048 }
 0x112   : > { %v5049_v36 = vpop.permute.xlu1 %2035  ;;  %p3899_p12 = scmp.ne.s32.totalorder %s5306_s8, %s3898_s18 }
 0x113   : > { %2025 = vrot.lane.b32.xlu0 %v3386_v50, %s3984_s11  ;;  %v2649_v50 = vsel %vm2643_vm14, %v2616_v51, %v2290_v38  ;;  %v2187_v38 = vrot.slane %v2185_v34, 1  ;;  %v2278_v34 = vrot.slane %v2276_v33, 1  ;;  %v2267_v51 = vor.u32 %v2266_v62, %v2262_v1 }
 0x114   : > { %1929 = vrot.lane.b32.xlu1 %v1897_v4, %s3982_s7  ;;  %v2467_v4 = vsel %vm2445_vm8, %v4268_v8, %v4875_v11  ;;  %v2519_v8 = vsel %vm2511_vm10, %v2486_v10, %v4937_v24  ;;  %v2384_v24 = vrot.slane %v5021_v20, 1  ;;  %v2271_v20 = vrot.slane %v2269_v15, 1  ;;  %p3900_p13 = pnand %p3899_p12, %p4049_p4 }
 0x115   : > { %v2418_v63 = vpop.permute.xlu0 %2417  ;;  %v2500_v12 = vsel %vm2478_vm9, %v2467_v4, %v4925_v27  ;;  %v2552_v27 = vsel %vm2544_vm11, %v2519_v8, %v4965_v53  ;;  %v2188_v29 = vsel %vm1067_vm5, %v2183_v30, %v2187_v38  ;;  %v2279_v49 = vor.u32 %v2278_v34, %v2274_v47  ;;  %v938_v4 = vld [vmem:[#allocation2 + $0xcc] sm:$0xe] }
 0x116   : > { %v2306_v44 = vpop.permute.xlu1 %2305  ;;  %v2682_v2 = vsel %vm2676_vm15, %v2649_v50, %v2418_v63  ;;  %v2533_v11 = vsel %vm2511_vm10, %v2500_v12, %v4953_v28  ;;  %v2585_v28 = vsel %vm2577_vm12, %v2552_v27, %v4990_v5  ;;  %v2272_v3 = vsel %vm1067_vm5, %v2267_v51, %v2271_v20  ;;  %p3901_p0 = pneg %p3900_p13 }
 0x117   : > { %2027 = vrot.lane.b32.xlu0 %v3387_v37, %s3984_s11  ;;  %3643 = vmatprep.mubr.msk.bf16.mxu0 %vm2736_vm3, %v2682_v2  ;;  %v2566_v14 = vsel %vm2544_vm11, %v2533_v11, %v4981_v6  ;;  %v2618_v53 = vsel %vm2610_vm13, %v2585_v28, %v5016_v39  ;;  %v3427_v30 = vcombine.low %v938_v4, %v5055_v56  ;;  %v2411_v11 = vrot.slane %v5097_v55, 1 }
 0x118   : > { %1931 = vrot.lane.b32.xlu1 %v1900_v19, %s3982_s7  ;;  %v2599_v31 = vsel %vm2577_vm12, %v2566_v14, %v5005_v13  ;;  %v2651_v5 = vsel %vm2643_vm14, %v2618_v53, %v5047_v35  ;;  %v2386_v35 = vrot.slane %v3419_v45, 1  ;;  %v2387_v19 = vrot.slane %v5039_v25, 1  ;;  %s3518_s7 = sshll.u32 %s3968_s15, 11  ;;  %s5312_s15 = scalar_lea.sflag [#allocation4], %s199_s28 }
 0x119   : > { %v5094_v37 = vpop.permute.xlu0 %1268  ;;  %v2632_v6 = vsel %vm2610_vm13, %v2599_v31, %v5028_v41  ;;  %v937_v41 = vld [vmem:[#allocation2 + $0xc0] sm:$0xe]  ;;  %v2283_v45 = vrot.slane %v2281_v42, 1  ;;  %v2410_v8 = vrot.slane %v3427_v30, 1 }
 0x11a   : > { %v2308_v26 = vpop.permute.xlu1 %2307  ;;  %v2665_v13 = vsel %vm2643_vm14, %v2632_v6, %v2306_v44  ;;  %v2385_v44 = vsel %vm1340_vm2, %v2383_v48, %v2384_v24  ;;  %v2388_v25 = vsel %vm1340_vm2, %v2386_v35, %v2387_v19 }
 0x11b   : > { %2297 = vrot.lane.b32.xlu0 %v2176_v21, %s3985_s21 }
 0x11c   : > { %2041 = vrot.lane.b32.xlu1 %v5053_v58, %s3984_s11  ;;  %v2469_v58 = vsel %vm2445_vm8, %v4307_v0, %v4911_v17 }
 0x11d   : > { %v2420_v32 = vpop.permute.xlu0 %2419  ;;  %v2502_v63 = vsel %vm2478_vm9, %v2469_v58, %v4939_v54  ;;  %v3426_v54 = vcombine.low %v937_v41, %v5033_v60 }
 0x11e   : > { %v2434_v59 = vpop.permute.xlu1 %2433  ;;  %v2684_v39 = vsel %vm2676_vm15, %v2651_v5, %v2420_v32  ;;  %v2535_v0 = vsel %vm2511_vm10, %v2502_v63, %v4967_v61  ;;  %v2455_v32 = vsel %vm2445_vm8, %v4470_v16, %v5094_v37 }
 0x11f   : > { %v2698_v50 = vsel %vm2676_vm15, %v2665_v13, %v2434_v59  ;;  %2299 = vrot.lane.b32.xlu0 %v2188_v29, %s3985_s21  ;;  %3644 = vmatmul.mubr.msk.bf16.gmra.mrb[4].mxu0 %vm2736_vm3, %v2684_v39  ;;  %v2407_v12 = vrot.slane %v3426_v54, 1 }
 0x120   : > { %2043 = vrot.lane.b32.xlu1 %v3395_v9, %s3984_s11  ;;  %3659 = vmatprep.mubr.msk.bf16.mxu1 %vm2736_vm3, %v2698_v50  ;;  %v2568_v9 = vsel %vm2544_vm11, %v2535_v0, %v4992_v52  ;;  %v2284_v52 = vsel %vm1067_vm5, %v2279_v49, %v2283_v45  ;;  %s5304_s11 = scalar_lea.hbm %s5362_s3, %s3518_s7 }
 0x121   : > { %v1271_v17 = vpop.permute.xlu0 %1270  ;;  %v2601_v21 = vsel %vm2577_vm12, %v2568_v9, %v5018_v23  ;;  %v2408_v23 = vrot.slane %v5067_v22, 1  ;;  %v2412_v22 = vsel %vm1340_vm2, %v2410_v8, %v2411_v11 }
 0x122   : > { %v5135_v2 = vpop.permute.xlu1 %1284  ;;  %v2634_v61 = vsel %vm2610_vm13, %v2601_v21, %v5049_v36  ;;  %v2457_v35 = vsel %vm2445_vm8, %v4500_v43, %v1271_v17 }
 0x123   : > { %2425 = vrot.lane.b32.xlu0 %v2385_v44, %s3986_s23  ;;  %v2667_v60 = vsel %vm2643_vm14, %v2634_v61, %v2308_v26  ;;  %v2409_v56 = vsel %vm1340_vm2, %v2407_v12, %v2408_v23  ;;  %v2471_v19 = vsel %vm2445_vm8, %v4517_v7, %v5135_v2 }
 0x124   : > { %2313 = vrot.lane.b32.xlu1 %v2272_v3, %s3985_s21 }
 0x125   : > { %v1398_v38 = vpop.permute.xlu0 %1397 }
 0x126   : > { %v2436_v10 = vpop.permute.xlu1 %2435  ;;  %v2488_v59 = vsel %vm2478_vm9, %v2455_v32, %v1398_v38 }
 0x127   : > { %v2700_v15 = vsel %vm2676_vm15, %v2667_v60, %v2436_v10  ;;  %2427 = vrot.lane.b32.xlu0 %v2388_v25, %s3986_s23 }
 0x128   : > { %3660 = vmatmul.mubr.msk.bf16.gmra.mrb[4].mxu1 %vm2736_vm3, %v2700_v15  ;;  %2315 = vrot.lane.b32.xlu1 %v2284_v52, %s3985_s21  ;;  %v5371_v52 = vld [vmem:[#allocation6_spill] sm:$0xff]  ;;  %s3902_s21 = sshll.u32 %s3987_s19, 4  ;;  %s3903_s21 = int_to_ptr.vmem [resolvable:$false] %s3902_s21 }
 0x129   : > { %v1400_v36 = vpop.permute.xlu0 %1399  ;;  %p3905_p1 = scmp.lt.s32.totalorder %s5306_s8, %s3903_s21 }
 0x12a   : > { %v1287_v33 = vpop.permute.xlu1 %1286  ;;  %v2490_v49 = vsel %vm2478_vm9, %v2457_v35, %v1400_v36 }
 0x12b   : > { %v2473_v12 = vsel %vm2445_vm8, %v5371_v52, %v1287_v33 }
 0x12c   : > { %2441 = vrot.lane.b32.xlu1 %v2409_v56, %s3986_s23 }
 0x12d   : > { %v1510_v26 = vpop.permute.xlu0 %1509 }
 0x12e   : > { %v1414_v1 = vpop.permute.xlu1 %1413  ;;  %v2521_v51 = vsel %vm2511_vm10, %v2488_v59, %v1510_v26 }
 0x12f   : > { %v2504_v0 = vsel %vm2478_vm9, %v2471_v19, %v1414_v1 }
 0x130   : > { %2443 = vrot.lane.b32.xlu1 %v2412_v22, %s3986_s23  ;;  %s3904_s23 = scalar_lea.vmem %s3903_s21, 4096 }
 0x131   : > { %v1512_v62 = vpop.permute.xlu0 %1511  ;;  %p3906_p2 = scmp.lt.s32.totalorder %s3904_s23, %s3898_s18 }
 0x132   : > { %v1416_v27 = vpop.permute.xlu1 %1415  ;;  %v2523_v3 = vsel %vm2511_vm10, %v2490_v49, %v1512_v62 }
 0x133   : > { %v2506_v23 = vsel %vm2478_vm9, %v2473_v12, %v1416_v27  ;;  %p3907_p3 = por %p3906_p2, %p3905_p1 }
 0x135   : > { %v1782_v14 = vpop.permute.xlu0 %1781  ;;  %p3908_p5 = pnand %p3907_p3, %p3901_p0 }
 0x136   : > { %v1526_v48 = vpop.permute.xlu1 %1525  ;;  %v2554_v39 = vsel %vm2544_vm11, %v2521_v51, %v1782_v14 }
 0x137   : > { %v2537_v43 = vsel %vm2511_vm10, %v2504_v0, %v1526_v48 }
 0x139   : > { %v1784_v24 = vpop.permute.xlu0 %1783 }
 0x13a   : > { %v1528_v28 = vpop.permute.xlu1 %1527  ;;  %v2556_v17 = vsel %vm2544_vm11, %v2523_v3, %v1784_v24 }
 0x13b   : > { %v2539_v36 = vsel %vm2511_vm10, %v2506_v23, %v1528_v28 }
 0x13d   : > { %v1910_v31 = vpop.permute.xlu0 %1909 }
 0x13e   : > { %v1798_v29 = vpop.permute.xlu1 %1797  ;;  %v2587_v41 = vsel %vm2577_vm12, %v2554_v39, %v1910_v31 }
 0x13f   : > { %v2570_v4 = vsel %vm2544_vm11, %v2537_v43, %v1798_v29 }
 0x141   : > { %v1912_v47 = vpop.permute.xlu0 %1911 }
 0x142   : > { %v1800_v53 = vpop.permute.xlu1 %1799  ;;  %v2589_v9 = vsel %vm2577_vm12, %v2556_v17, %v1912_v47 }
 0x143   : > { %v2572_v8 = vsel %vm2544_vm11, %v2539_v36, %v1800_v53 }
 0x145   : > { %v2022_v6 = vpop.permute.xlu0 %2021 }
 0x146   : > { %v1926_v55 = vpop.permute.xlu1 %1925  ;;  %v2620_v58 = vsel %vm2610_vm13, %v2587_v41, %v2022_v6 }
 0x147   : > { %v2603_v21 = vsel %vm2577_vm12, %v2570_v4, %v1926_v55 }
 0x149   : > { %v2024_v20 = vpop.permute.xlu0 %2023 }
 0x14a   : > { %v1928_v34 = vpop.permute.xlu1 %1927  ;;  %v2622_v7 = vsel %vm2610_vm13, %v2589_v9, %v2024_v20 }
 0x14b   : > { %v2605_v11 = vsel %vm2577_vm12, %v2572_v8, %v1928_v34 }
 0x14d   : > { %v2294_v5 = vpop.permute.xlu0 %2293 }
 0x14e   : > { %v2038_v13 = vpop.permute.xlu1 %2037  ;;  %v2653_v63 = vsel %vm2643_vm14, %v2620_v58, %v2294_v5 }
 0x14f   : > { %v2636_v2 = vsel %vm2610_vm13, %v2603_v21, %v2038_v13 }
 0x151   : > { %v2296_v42 = vpop.permute.xlu0 %2295 }
 0x152   : > { %v2040_v50 = vpop.permute.xlu1 %2039  ;;  %v2655_v61 = vsel %vm2643_vm14, %v2622_v7, %v2296_v42 }
 0x153   : > { %v2638_v26 = vsel %vm2610_vm13, %v2605_v11, %v2040_v50 }
 0x155   : > { %v2422_v44 = vpop.permute.xlu0 %2421 }
 0x156   : > { %v2686_v16 = vsel %vm2676_vm15, %v2653_v63, %v2422_v44  ;;  %v2310_v37 = vpop.permute.xlu1 %2309 }
 0x157   : > { %3647 = vmatprep.mubr.msk.bf16.mxu0 %vm2736_vm3, %v2686_v16  ;;  %v2669_v30 = vsel %vm2643_vm14, %v2636_v2, %v2310_v37 }
 0x159   : > { %v1273_v45 = vpop.permute.xlu0 %1272 }
 0x15a   : > { %v2312_v54 = vpop.permute.xlu1 %2311  ;;  %v2459_v50 = vsel %vm2445_vm8, %v4765_v46, %v1273_v45 }
 0x15b   : > { %v2671_v22 = vsel %vm2643_vm14, %v2638_v26, %v2312_v54 }
 0x15d   : > { %v2424_v25 = vpop.permute.xlu0 %2423 }
 0x15e   : > { %v2688_v60 = vsel %vm2676_vm15, %v2655_v61, %v2424_v25  ;;  %v2438_v38 = vpop.permute.xlu1 %2437 }
 0x15f   : > { %v2702_v10 = vsel %vm2676_vm15, %v2669_v30, %v2438_v38  ;;  %3648 = vmatmul.mubr.msk.bf16.gmra.mrb[8].mxu0 %vm2736_vm3, %v2688_v60 }
 0x160   : > { %3663 = vmatprep.mubr.msk.bf16.mxu1 %vm2736_vm3, %v2702_v10 }
 0x161   : > { %v1275_v15 = vpop.permute.xlu0 %1274 }
 0x162   : > { %v1289_v56 = vpop.permute.xlu1 %1288  ;;  %v2461_v58 = vsel %vm2445_vm8, %v4831_v57, %v1275_v15 }
 0x163   : > { %v2475_v54 = vsel %vm2445_vm8, %v4841_v18, %v1289_v56 }
 0x165   : > { %v1402_v1 = vpop.permute.xlu0 %1401 }
 0x166   : > { %v2440_v62 = vpop.permute.xlu1 %2439  ;;  %v2492_v41 = vsel %vm2478_vm9, %v2459_v50, %v1402_v1 }
 0x167   : > { %v2704_v33 = vsel %vm2676_vm15, %v2671_v22, %v2440_v62  ;;  %v5247_v22 = vld [vmem:[%s5361_s2] ss:$0 sm:$0xff] }
 0x168   : > { %3664 = vmatmul.mubr.msk.bf16.gmra.mrb[8].mxu1 %vm2736_vm3, %v2704_v33 }
 0x169   : > { %v1404_v14 = vpop.permute.xlu0 %1403 }
 0x16a   : > { %v1291_v27 = vpop.permute.xlu1 %1290  ;;  %v2494_v19 = vsel %vm2478_vm9, %v2461_v58, %v1404_v14 }
 0x16b   : > { %v2477_v60 = vsel %vm2445_vm8, %v4900_v40, %v1291_v27 }
 0x16d   : > { %v1514_v48 = vpop.permute.xlu0 %1513 }
 0x16e   : > { %v1418_v24 = vpop.permute.xlu1 %1417  ;;  %v2525_v35 = vsel %vm2511_vm10, %v2492_v41, %v1514_v48 }
 0x16f   : > { %v2508_v9 = vsel %vm2478_vm9, %v2475_v54, %v1418_v24 }
 0x171   : > { %v1516_v28 = vpop.permute.xlu0 %1515 }
 0x172   : > { %v1420_v31 = vpop.permute.xlu1 %1419  ;;  %v2527_v0 = vsel %vm2511_vm10, %v2494_v19, %v1516_v28 }
 0x173   : > { %v2510_v38 = vsel %vm2478_vm9, %v2477_v60, %v1420_v31 }
 0x175   : > { %v1786_v29 = vpop.permute.xlu0 %1785 }
 0x176   : > { %v1530_v47 = vpop.permute.xlu1 %1529  ;;  %v2558_v44 = vsel %vm2544_vm11, %v2525_v35, %v1786_v29 }
 0x177   : > { %v2541_v2 = vsel %vm2511_vm10, %v2508_v9, %v1530_v47 }
 0x179   : > { %v1788_v53 = vpop.permute.xlu0 %1787 }
 0x17a   : > { %v1532_v6 = vpop.permute.xlu1 %1531  ;;  %v2560_v45 = vsel %vm2544_vm11, %v2527_v0, %v1788_v53 }
 0x17b   : > { %v2543_v52 = vsel %vm2511_vm10, %v2510_v38, %v1532_v6 }
 0x17d   : > { %v1914_v55 = vpop.permute.xlu0 %1913 }
 0x17e   : > { %v1802_v20 = vpop.permute.xlu1 %1801  ;;  %v2591_v37 = vsel %vm2577_vm12, %v2558_v44, %v1914_v55 }
 0x17f   : > { %v2574_v30 = vsel %vm2544_vm11, %v2541_v2, %v1802_v20 }
 0x181   : > { %v1916_v34 = vpop.permute.xlu0 %1915 }
 0x182   : > { %v1804_v5 = vpop.permute.xlu1 %1803  ;;  %v2593_v17 = vsel %vm2577_vm12, %v2560_v45, %v1916_v34 }
 0x183   : > { %v2576_v15 = vsel %vm2544_vm11, %v2543_v52, %v1804_v5 }
 0x185   : > { %v2026_v13 = vpop.permute.xlu0 %2025 }
 0x186   : > { %v1930_v32 = vpop.permute.xlu1 %1929  ;;  %v2624_v49 = vsel %vm2610_vm13, %v2591_v37, %v2026_v13 }
 0x187   : > { %v2607_v18 = vsel %vm2577_vm12, %v2574_v30, %v1930_v32 }
 0x189   : > { %v2028_v59 = vpop.permute.xlu0 %2027 }
 0x18a   : > { %v1932_v51 = vpop.permute.xlu1 %1931  ;;  %v2626_v4 = vsel %vm2610_vm13, %v2593_v17, %v2028_v59 }
 0x18b   : > { %v2609_v56 = vsel %vm2577_vm12, %v2576_v15, %v1932_v51 }
 0x18d   : > { %v2298_v42 = vpop.permute.xlu0 %2297 }
 0x18e   : > { %v2042_v39 = vpop.permute.xlu1 %2041  ;;  %v2657_v46 = vsel %vm2643_vm14, %v2624_v49, %v2298_v42 }
 0x18f   : > { %v2640_v10 = vsel %vm2610_vm13, %v2607_v18, %v2042_v39 }
 0x191   : > { %v2300_v63 = vpop.permute.xlu0 %2299 }
 0x192   : > { %v2044_v16 = vpop.permute.xlu1 %2043  ;;  %v2659_v21 = vsel %vm2643_vm14, %v2626_v4, %v2300_v63 }
 0x193   : > { %v2642_v40 = vsel %vm2610_vm13, %v2609_v56, %v2044_v16 }
 0x195   : > { %v2426_v3 = vpop.permute.xlu0 %2425 }
 0x196   : > { %v2690_v57 = vsel %vm2676_vm15, %v2657_v46, %v2426_v3  ;;  %v2314_v43 = vpop.permute.xlu1 %2313 }
 0x197   : > { %3651 = vmatprep.mubr.msk.bf16.mxu0 %vm2736_vm3, %v2690_v57  ;;  %v2673_v12 = vsel %vm2643_vm14, %v2640_v10, %v2314_v43 }
 0x199   : > { %v2428_v7 = vpop.permute.xlu0 %2427 }
 0x19a   : > { %v2692_v61 = vsel %vm2676_vm15, %v2659_v21, %v2428_v7  ;;  %v2316_v25 = vpop.permute.xlu1 %2315 }
 0x19b   : > { %3652 = vmatmul.mubr.msk.bf16.gmra.mrb[12].mxu0 %vm2736_vm3, %v2692_v61  ;;  %v2675_v8 = vsel %vm2643_vm14, %v2642_v40, %v2316_v25 }
 0x19e   : > { %v2442_v23 = vpop.permute.xlu1 %2441 }
 0x19f   : > { %v2706_v36 = vsel %vm2676_vm15, %v2673_v12, %v2442_v23 }
 0x1a0   : > { %3667 = vmatprep.mubr.msk.bf16.mxu1 %vm2736_vm3, %v2706_v36 }
 0x1a2   : > { %v2444_v11 = vpop.permute.xlu1 %2443 }
 0x1a3   : > { %v2708_v26 = vsel %vm2676_vm15, %v2675_v8, %v2444_v11 }
 0x1a4   : > { %3668 = vmatmul.mubr.msk.bf16.gmra.mrb[12].mxu1 %vm2736_vm3, %v2708_v26 }
 0x1b2   : > { %v3641_v1 = vpop.f32.mrb[0].mxu0 }
 0x1b3   : > { %v2807_v62 = vpop.f32.mrb[1].mxu0  ;;  %v2816_v14 = vadd.f32 %v3641_v1, %v5247_v22 }
 0x1b4   : > { %v3642_v33 = vpop.f32.mrb[2].mxu0  ;;  %v2808_v24 = vadd.f32 %v5247_v22, %v2807_v62 }
 0x1b5   : > { %v2819_v27 = vadd.f32 %v3642_v33, %v5247_v22  ;;  %v2810_v48 = vpop.f32.mrb[3].mxu0 }
 0x1b6   : > { %v2811_v28 = vadd.f32 %v5247_v22, %v2810_v48 }
 0x1b7   : > { %v3527_v31 = vpack.c.bf16 %v2819_v27, %v2816_v14 }
 0x1b8   : > { %v3522_v29 = vpack.c.bf16 %v2811_v28, %v2808_v24 }
 0x1b9   : > { %3599 = vst [vmem:[%s5255_s6 + $0x8] sm:$0xff] %v3527_v31  }
 0x1ba   : > { %3523 = vst [vmem:[%s5255_s6] sm:$0xff] %v3522_v29  }
 0x1bb   : > { %v3657_v47 = vpop.f32.mrb[0].mxu1 }
 0x1bc   : > { %v2871_v53 = vpop.f32.mrb[1].mxu1  ;;  %v2880_v55 = vadd.f32 %v3657_v47, %v5247_v22 }
 0x1bd   : > { %v3658_v6 = vpop.f32.mrb[2].mxu1  ;;  %v2872_v5 = vadd.f32 %v5247_v22, %v2871_v53 }
 0x1be   : > { %v2883_v20 = vadd.f32 %v3658_v6, %v5247_v22  ;;  %v2874_v34 = vpop.f32.mrb[3].mxu1 }
 0x1bf   : > { %v2875_v13 = vadd.f32 %v5247_v22, %v2874_v34 }
 0x1c0   : > { %v3567_v32 = vpack.c.bf16 %v2883_v20, %v2880_v55 }
 0x1c1   : > { %v3562_v59 = vpack.c.bf16 %v2875_v13, %v2872_v5 }
 0x1c2   : > { %3607 = vst [vmem:[%s5255_s6 + $0x48] sm:$0xff] %v3567_v32  }
 0x1c3   : > { %3606 = vst [vmem:[%s5255_s6 + $0x40] sm:$0xff] %v3562_v59  }
 0x1f2   : > { %v3645_v51 = vpop.f32.mrb[4].mxu0 }
 0x1f3   : > { %v2823_v42 = vpop.f32.mrb[5].mxu0  ;;  %v2832_v50 = vadd.f32 %v3645_v51, %v5247_v22 }
 0x1f4   : > { %v3646_v39 = vpop.f32.mrb[6].mxu0  ;;  %v2824_v35 = vadd.f32 %v5247_v22, %v2823_v42 }
 0x1f5   : > { %v2835_v41 = vadd.f32 %v3646_v39, %v5247_v22  ;;  %v2826_v58 = vpop.f32.mrb[7].mxu0 }
 0x1f6   : > { %v2827_v63 = vadd.f32 %v5247_v22, %v2826_v58 }
 0x1f7   : > { %v3537_v44 = vpack.c.bf16 %v2835_v41, %v2832_v50 }
 0x1f8   : > { %v3532_v16 = vpack.c.bf16 %v2827_v63, %v2824_v35 }
 0x1f9   : > { %3601 = vst [vmem:[%s5255_s6 + $0x18] sm:$0xff] %v3537_v44  }
 0x1fa   : > { %3600 = vst [vmem:[%s5255_s6 + $0x10] sm:$0xff] %v3532_v16  }
 0x1fb   : > { %v3661_v37 = vpop.f32.mrb[4].mxu1 }
 0x1fc   : > { %v2887_v19 = vpop.f32.mrb[5].mxu1  ;;  %v2896_v0 = vadd.f32 %v3661_v37, %v5247_v22 }
 0x1fd   : > { %v3662_v49 = vpop.f32.mrb[6].mxu1  ;;  %v2888_v45 = vadd.f32 %v5247_v22, %v2887_v19 }
 0x1fe   : > { %v2899_v46 = vadd.f32 %v3662_v49, %v5247_v22  ;;  %v2890_v3 = vpop.f32.mrb[7].mxu1 }
 0x1ff   : > { %v2891_v57 = vadd.f32 %v5247_v22, %v2890_v3 }
 0x200   : > { %v3577_v43 = vpack.c.bf16 %v2899_v46, %v2896_v0 }
 0x201   : > { %v3572_v17 = vpack.c.bf16 %v2891_v57, %v2888_v45 }
 0x202   : > { %3609 = vst [vmem:[%s5255_s6 + $0x58] sm:$0xff] %v3577_v43  }
 0x203   : > { %3608 = vst [vmem:[%s5255_s6 + $0x50] sm:$0xff] %v3572_v17  }
 0x232   : > { %v3649_v54 = vpop.f32.mrb[8].mxu0 }
 0x233   : > { %v2839_v4 = vpop.f32.mrb[9].mxu0  ;;  %v2848_v21 = vadd.f32 %v3649_v54, %v5247_v22 }
 0x234   : > { %v3650_v9 = vpop.f32.mrb[10].mxu0  ;;  %v2840_v61 = vadd.f32 %v5247_v22, %v2839_v4 }
 0x235   : > { %v2851_v7 = vadd.f32 %v3650_v9, %v5247_v22  ;;  %v2842_v2 = vpop.f32.mrb[11].mxu0 }
 0x236   : > { %v2843_v25 = vadd.f32 %v5247_v22, %v2842_v2 }
 0x237   : > { %v3547_v30 = vpack.c.bf16 %v2851_v7, %v2848_v21 }
 0x238   : > { %v3542_v60 = vpack.c.bf16 %v2843_v25, %v2840_v61 }
 0x239   : > { %3603 = vst [vmem:[%s5255_s6 + $0x28] sm:$0xff] %v3547_v30  }
 0x23a   : > { %3602 = vst [vmem:[%s5255_s6 + $0x20] sm:$0xff] %v3542_v60  }
 0x23b   : > { %v3665_v18 = vpop.f32.mrb[8].mxu1 }
 0x23c   : > { %v2903_v38 = vpop.f32.mrb[9].mxu1  ;;  %v2912_v52 = vadd.f32 %v3665_v18, %v5247_v22 }
 0x23d   : > { %v3666_v10 = vpop.f32.mrb[10].mxu1  ;;  %v2904_v15 = vadd.f32 %v5247_v22, %v2903_v38 }
 0x23e   : > { %v2915_v12 = vadd.f32 %v3666_v10, %v5247_v22  ;;  %v2906_v23 = vpop.f32.mrb[11].mxu1 }
 0x23f   : > { %v2907_v36 = vadd.f32 %v5247_v22, %v2906_v23 }
 0x240   : > { %v3587_v56 = vpack.c.bf16 %v2915_v12, %v2912_v52 }
 0x241   : > { %v3582_v40 = vpack.c.bf16 %v2907_v36, %v2904_v15 }
 0x242   : > { %3611 = vst [vmem:[%s5255_s6 + $0x68] sm:$0xff] %v3587_v56  }
 0x243   : > { %3610 = vst [vmem:[%s5255_s6 + $0x60] sm:$0xff] %v3582_v40  }
 0x26e   : > { %v3653_v8 = vpop.f32.mrb[12].mxu0 }
 0x26f   : > { %v2855_v11 = vpop.f32.mrb[13].mxu0  ;;  %v2864_v1 = vadd.f32 %v3653_v8, %v5247_v22 }
 0x270   : > { %v3654_v26 = vpop.f32.mrb[14].mxu0  ;;  %v2856_v14 = vadd.f32 %v5247_v22, %v2855_v11 }
 0x271   : > { %v2867_v62 = vadd.f32 %v3654_v26, %v5247_v22  ;;  %v2858_v33 = vpop.f32.mrb[15].mxu0 }
 0x272   : > { %v2859_v27 = vadd.f32 %v5247_v22, %v2858_v33 }
 0x273   : > { %v3557_v48 = vpack.c.bf16 %v2867_v62, %v2864_v1 }
 0x274   : > { %v3552_v24 = vpack.c.bf16 %v2859_v27, %v2856_v14 }
 0x275   : > { %3605 = vst [vmem:[%s5255_s6 + $0x38] sm:$0xff] %v3557_v48  }
 0x276   : > { %3604 = vst [vmem:[%s5255_s6 + $0x30] sm:$0xff] %v3552_v24  }
 0x277   : > { %v3669_v28 = vpop.f32.mrb[12].mxu1 }
 0x278   : > { %v2919_v31 = vpop.f32.mrb[13].mxu1  ;;  %v2928_v47 = vadd.f32 %v3669_v28, %v5247_v22 }
 0x279   : > { %v3670_v29 = vpop.f32.mrb[14].mxu1  ;;  %v2920_v55 = vadd.f32 %v5247_v22, %v2919_v31 }
 0x27a   : > { %v2931_v53 = vadd.f32 %v3670_v29, %v5247_v22  ;;  %v2922_v6 = vpop.f32.mrb[15].mxu1 }
 0x27b   : > { %v2923_v20 = vadd.f32 %v5247_v22, %v2922_v6 }
 0x27c   : > { %v3597_v34 = vpack.c.bf16 %v2931_v53, %v2928_v47 }
 0x27d   : > { %v3592_v5 = vpack.c.bf16 %v2923_v20, %v2920_v55 }
 0x27e   : > { %3613 = vst [vmem:[%s5255_s6 + $0x78] sm:$0xff] %v3597_v34  }
 0x27f   : > { %3612 = vst [vmem:[%s5255_s6 + $0x70] sm:$0xff] %v3592_v5  }
 0x280   : > { %3911 = shalt.err (!%p3908_p5)
}
 0x281   : > { %s3912_s26 = scalar_lea.hbm %s5304_s11, 2048  ;;  %s3916_s29 = scalar_lea.hbm %s5362_s3, 4096 }
 0x282   : > { %p3913_p6 = scmp.ne.s32.totalorder %s5304_s11, %s3912_s26  ;;  %p3917_p10 = scmp.lt.u32.totalorder %s5304_s11, %s5362_s3 }
 0x283   : > { %p3918_p11 = scmp.lt.u32.totalorder %s3916_s29, %s3912_s26  ;;  %p3920_p13 = scmp.lt.u32.totalorder %s3912_s26, %s5304_s11 }
 0x284   : > { %p3914_p7 = pnand %p3913_p6, %p4049_p4 }
 0x285   : > { %p3919_p12 = por %p3918_p11, %p3917_p10 }
 0x286   : > { %p3915_p9 = pneg %p3914_p7 }
 0x287   : > { %p3921_p0 = por %p3920_p13, %p3919_p12 }
 0x289   : > { %p3922_p1 = pnand %p3921_p0, %p3915_p9 }
 0x28b   : > { %3925 = shalt.err (!%p3922_p1)
}
 0x28c   : > { %s3988_s6 = smov 64  }
 0x28d   : > { %3679 = dma.vmem_to_hbm [thread:$0]  (%p4049_p4), %s5306_s8, 2048, %s5304_s11, %s5312_s15, %s3988_s6, %s3988_s6, %s3980_s5  }
 0x28e PF: > { %p3685_p2 = scmp.ge.s32.totalorder %s3976_s17, 2  ;;  %s3124_s7 = sand.u32 1, %s3956_s12  }
 0x28f   : > { %s3125_s9 = scalar_lea.sflag [#allocation4], %s3124_s7 }
 0x290   : > { %p3682_p3 = pnand %p3685_p2, %p4056_p8 }
 0x292   : > { %3951 = dma.done.wait (!%p3682_p3), %s3125_s9, 2048  }
 0x293   : > { %3953 = vsyncadd (!%p3682_p3), %s3125_s9, 4294965248  ;;  %s16_s17 = sadd.s32 1, %s3976_s17   ;;  %s5372_s12 = smov %s3960_s13 }
 0x294   : > { %p13_p5 = scmp.ge.s32.totalorder %s16_s17, 4   ;;  %s5373_s13 = smov %s3964_s14 }
 0x295   : > { %s5374_s14 = smov %s4062_s25  ;;  %s5375_s15 = smov %s3972_s16 }
 0x296   : > { %s5376_s16 = smov %s5378_s20  ;;  %15 = sbr.rel (!%p13_p5) target bundleno = 4 (0x4), region = 75 }
 0x29d   :  { %3130 = vsyncpa [#allocation4], 1 }
 0x29e   :  { %3132 = vsyncpa [#allocation4 + $0x1], 1 }

</bundles_post_ra>
